<compile_context>
chip_gen: v6e
topology: v6e:2x2x1
jax: 0.10.0
libtpu: 0.0.40
codegen_flags: <defaults>
</compile_context>

<pallas_src>
import functools
import math

import jax
import jax.numpy as jnp
from jax.experimental import pallas as pl
from jax.experimental.pallas import tpu as pltpu


_T = 8  # instances per grid step: fills vreg sublanes; T*W = 128 fills MXU K at W=16.


def _grid_sample_kernel(ix_ref, iy_ref, xbd_ref, o_ref, *, C, H, W, T):
    """T instances of bilinear grid_sample (align_corners=False, zero padding),
    matching F.grid_sample defaults, vectorized across T.

    ix_ref, iy_ref: (T, 1, HW) f32 source pixel coordinates (from affine_grid)
    xbd_ref:        (T*C*H, T*W) block-diagonal patch LHS (native dtype)
    o_ref:          (T, C, HW)  f32 lane-dense output block
    """
    HW = H * W

    # Float "hat" (tent) interpolation weights.  Out-of-range / NaN coordinates
    # never produce positive weight against the [0,W) / [0,H) row ids, so
    # zero padding is implicit and no clamps or validity masks are needed.
    rw = jax.lax.broadcasted_iota(jnp.int32, (T, W, HW), 1).astype(jnp.float32)
    rh = jax.lax.broadcasted_iota(jnp.int32, (T, H, HW), 1).astype(jnp.float32)
    ax = jnp.maximum(0.0, 1.0 - jnp.abs(rw - ix_ref[...]))      # (T, W, HW)
    ay = jnp.maximum(0.0, 1.0 - jnp.abs(rh - iy_ref[...]))      # (T, H, HW)

    # x-direction interpolation: one K-stacked MXU matmul for all T instances.
    lhs = xbd_ref[...].astype(jnp.float32)                      # (T*C*H, T*W)
    tmp = jnp.dot(lhs, ax.reshape(T * W, HW),
                  preferred_element_type=jnp.float32)           # (T*C*H, HW)

    # y-direction interpolation: weighted reduce over H on the VPU.
    out = jnp.sum(tmp.reshape(T, C, H, HW) * ay[:, None, :, :], axis=2)  # (T,C,HW)
    o_ref[...] = out.astype(o_ref.dtype)


def _is_megacore():
    """Best-effort: does the attached TPU expose 2 TensorCores per device?"""
    try:
        kind = jax.devices()[0].device_kind.lower()
    except Exception:
        return False
    return any(tag in kind for tag in ("v4", "v5p", "v7"))


def _compute_theta(bboxes, patch_h, patch_w, patch_ori_size, scale_rate, angle,
                   scale_max=None):
    """Plain-JAX glue replicating the PyTorch theta construction
    (p9_scale=True, rand_shift_gate=False, rdrop=False).

    Note: like the PyTorch original, a degenerate bbox (x1==x2, y1==y2) gives
    scale==0 and therefore inf/NaN theta; no guard is added to keep semantics
    (the hat-weight kernel then produces zero/NaN output rather than aliasing
    a wrapped integer index).
    """
    B, L, _ = bboxes.shape
    N = B * L
    x1 = bboxes[:, :, 0]
    y1 = bboxes[:, :, 1]
    x2 = bboxes[:, :, 2]
    y2 = bboxes[:, :, 3]
    bw = x2 - x1
    bh = y2 - y1
    target_cx = (x1 + x2).reshape(N) / 2.0
    target_cy = (y1 + y2).reshape(N) / 2.0
    target_cy = target_cy - bh.reshape(N) * 0.1            # p9_scale branch
    tx = (0.5 - target_cx) * 2.0
    ty = (0.5 - target_cy) * 2.0
    bw_p = bw * float(patch_w)                             # *= adv_patch.size(-1)
    bh_p = bh * float(patch_h)                             # *= adv_patch.size(-2)
    target_size = scale_rate * jnp.sqrt(bw_p ** 2 + bh_p ** 2).reshape(N)
    scale = target_size / float(patch_ori_size)
    if scale_max is not None and scale_max > 0:            # cfg_patch.scale_max clamp
        scale = jnp.clip(scale, 0.0, scale_max)
    sin = jnp.sin(angle)
    cos = jnp.cos(angle)
    theta = jnp.stack([
        cos / scale, sin / scale, tx * cos / scale + ty * sin / scale,
        -sin / scale, cos / scale, -tx * sin / scale + ty * cos / scale,
    ], axis=-1)
    return theta.reshape(N, 2, 3).astype(jnp.float32)


def patch_transformer_forward(adv_patch_batch, bboxes_batch, patch_ori_size,
                              scale_rate, angle, scale_max=None):
    """adv_patch_batch: (B, L, C, H, W); bboxes_batch: (B, L, 6); angle: (B*L,).
    Returns (B, L, C, H, W) of affine-warped patches."""
    B, L, C, H, W = adv_patch_batch.shape
    N = B * L
    HW = H * W
    T = _T
    # TODO(synk): for large H*W add a second grid axis tiling HW (keeps ax/tmp
    # working sets bounded under v7x's 64 MiB VMEM); not needed at 16x16.

    # Single-TC chips (v5e/v6e): fewest possible grid steps.  Megacore chips
    # (v4/v5p/v7x): pad to an even number of >=2 "parallel" steps so both
    # TensorCores get work.
    unit = 2 * T if _is_megacore() else T
    n_pad = ((max(N, 1) + unit - 1) // unit) * unit
    steps = n_pad // T

    theta6 = _compute_theta(bboxes_batch, H, W, patch_ori_size, scale_rate,
                            angle, scale_max).reshape(N, 6)

    # F.affine_grid (align_corners=False) coordinates, folded directly to input
    # pixel coordinates (F.grid_sample convention).  Tiny per-pixel scalar
    # affine -> done in the wrapper so the kernel is fully vectorized over T.
    jj = jnp.arange(W, dtype=jnp.float32)
    ii = jnp.arange(H, dtype=jnp.float32)
    xs = (2.0 * jj + 1.0) / float(W) - 1.0
    ys = (2.0 * ii + 1.0) / float(H) - 1.0
    xs_flat = jnp.tile(xs, H)                               # (HW,): xs[p % W]
    ys_flat = jnp.repeat(ys, W)                             # (HW,): ys[p // W]
    gx = theta6[:, 0:1] * xs_flat[None] + theta6[:, 1:2] * ys_flat[None] + theta6[:, 2:3]
    gy = theta6[:, 3:4] * xs_flat[None] + theta6[:, 4:5] * ys_flat[None] + theta6[:, 5:6]
    ix = ((gx + 1.0) * float(W) - 1.0) * 0.5                # (N, HW) source x
    iy = ((gy + 1.0) * float(H) - 1.0) * 0.5                # (N, HW) source y
    ix = jnp.pad(ix, ((0, n_pad - N), (0, 0))).reshape(n_pad, 1, HW)
    iy = jnp.pad(iy, ((0, n_pad - N), (0, 0))).reshape(n_pad, 1, HW)

    # Block-diagonal LHS per grid step: fuses the T per-instance matmuls into
    # one (T*C*H, T*W) @ (T*W, HW) MXU call.  Patch stays in its native dtype;
    # the kernel upcasts to f32 in VMEM.
    x = adv_patch_batch.reshape(N, C * H, W)
    x = jnp.pad(x, ((0, n_pad - N), (0, 0), (0, 0)))
    x_steps = x.reshape(steps, T, C * H, W)
    eye = jnp.eye(T, dtype=x.dtype)
    xbd = (x_steps[:, :, :, None, :] * eye[None, :, None, :, None]).reshape(
        steps, T * C * H, T * W)

    kernel = functools.partial(_grid_sample_kernel, C=C, H=H, W=W, T=T)
    out = pl.pallas_call(
        kernel,
        out_shape=jax.ShapeDtypeStruct((n_pad, C, HW), jnp.float32),
        grid=(steps,),
        in_specs=[
            pl.BlockSpec((T, 1, HW), lambda n: (n, 0, 0)),              # ix
            pl.BlockSpec((T, 1, HW), lambda n: (n, 0, 0)),              # iy
            pl.BlockSpec((None, T * C * H, T * W), lambda n: (n, 0, 0)),  # xbd
        ],
        out_specs=pl.BlockSpec((T, C, HW), lambda n: (n, 0, 0)),
        compiler_params=pltpu.CompilerParams(
            dimension_semantics=("parallel",)),
    )(ix, iy, xbd)
    return out[:N].reshape(B, L, C, H, W)


def _grid_sample_ref(x, theta):
    """Pure-JAX reference (gather-based) bilinear grid_sample for checking."""
    N, C, H, W = x.shape
    jj = (2.0 * jnp.arange(W, dtype=jnp.float32) + 1.0) / W - 1.0
    ii = (2.0 * jnp.arange(H, dtype=jnp.float32) + 1.0) / H - 1.0
    xs, ys = jnp.meshgrid(jj, ii)  # (H, W) each

    def one(img, th):
        gx = th[0, 0] * xs + th[0, 1] * ys + th[0, 2]
        gy = th[1, 0] * xs + th[1, 1] * ys + th[1, 2]
        ix = ((gx + 1.0) * W - 1.0) * 0.5
        iy = ((gy + 1.0) * H - 1.0) * 0.5
        x0f = jnp.floor(ix)
        y0f = jnp.floor(iy)
        x0 = x0f.astype(jnp.int32)
        y0 = y0f.astype(jnp.int32)
        x1, y1 = x0 + 1, y0 + 1
        wx1 = ix - x0f
        wx0 = 1.0 - wx1
        wy1 = iy - y0f
        wy0 = 1.0 - wy1

        def corner(xi, yi, w):
            valid = (xi >= 0) & (xi < W) & (yi >= 0) & (yi < H)
            vals = img[:, jnp.clip(yi, 0, H - 1), jnp.clip(xi, 0, W - 1)]
            return vals * jnp.where(valid, w, 0.0)

        return (corner(x0, y0, wx0 * wy0) + corner(x1, y0, wx1 * wy0)
                + corner(x0, y1, wx0 * wy1) + corner(x1, y1, wx1 * wy1))

    return jax.vmap(one)(x, theta)


if __name__ == "__main__":
    B, L, C, H, W = 2, 4, 3, 16, 16
    N = B * L
    patch_ori_size = 16.0
    scale_rate = 0.2                        # cfg.ATTACKER.PATCH.SCALE
    min_angle = -20.0 / 180.0 * math.pi
    max_angle = 20.0 / 180.0 * math.pi

    key = jax.random.PRNGKey(0)
    k1, k2, k3, k4 = jax.random.split(key, 4)
    adv_patch_batch = jax.random.uniform(k1, (B, L, C, H, W), dtype=jnp.float32)
    # bboxes: [x1, y1, x2, y2, conf, cls_id] in normalized image coordinates
    xy1 = jax.random.uniform(k2, (B, L, 2), minval=0.05, maxval=0.45,
                             dtype=jnp.float32)
    wh = jax.random.uniform(k3, (B, L, 2), minval=0.2, maxval=0.5,
                            dtype=jnp.float32)
    xy2 = jnp.clip(xy1 + wh, 0.0, 1.0)
    bboxes_batch = jnp.concatenate(
        [xy1, xy2, jnp.zeros((B, L, 2), jnp.float32)], axis=-1)
    # rand_rotate_gate=True: random angle per bbox (deterministic via PRNGKey)
    # TODO(synk): rdrop / rand_shift_gate branches (default False) not implemented.
    angle = jax.random.uniform(k4, (N,), minval=min_angle, maxval=max_angle,
                               dtype=jnp.float32)

    out = patch_transformer_forward(adv_patch_batch, bboxes_batch,
                                    patch_ori_size, scale_rate, angle)
    out = jax.block_until_ready(out)
    assert out.shape == (B, L, C, H, W)

    # Sanity check against a pure-JAX gather-based reference.
    theta = _compute_theta(bboxes_batch, H, W, patch_ori_size, scale_rate, angle)
    ref = _grid_sample_ref(adv_patch_batch.reshape(N, C, H, W), theta)
    ref = ref.reshape(B, L, C, H, W)
    err = float(jnp.max(jnp.abs(out - ref)))
    assert err < 1e-4, f"max abs err {err}"
    print("KERNEL_OK")
</pallas_src>

<mosaic_0001>
module attributes {stable_mosaic.version = 11 : i64} {
  func.func @_grid_sample_kernel(%arg0: i32, %arg1: memref<8x1x256xf32, #tpu.memory_space<vmem>>, %arg2: memref<8x1x256xf32, #tpu.memory_space<vmem>>, %arg3: memref<1x384x128xf32, #tpu.memory_space<vmem>>, %arg4: memref<8x3x256xf32, #tpu.memory_space<vmem>>) attributes {dimension_semantics = [#tpu.dimension_semantics<parallel>], iteration_bounds = array<i64: 1>, scalar_prefetch = 0 : i64, scratch_operands = 0 : i64, tpu.core_type = #tpu.core_type<tc>, window_params = [{transform_indices = @transform_0, window_bounds = array<i64: 8, 1, 256>}, {transform_indices = @transform_1, window_bounds = array<i64: 8, 1, 256>}, {transform_indices = @transform_2, window_bounds = array<i64: 1, 384, 128>}, {transform_indices = @transform_3, window_bounds = array<i64: 8, 3, 256>}]} {
    %0 = tpu.iota {dimensions = array<i32: 1>} : vector<8x16x256xi32>
    %1 = arith.sitofp %0 : vector<8x16x256xi32> to vector<8x16x256xf32>
    %2 = tpu.iota {dimensions = array<i32: 1>} : vector<8x16x256xi32>
    %3 = arith.sitofp %2 : vector<8x16x256xi32> to vector<8x16x256xf32>
    %c0 = arith.constant 0 : index
    %c0_0 = arith.constant 0 : index
    %c0_1 = arith.constant 0 : index
    %4 = vector.load %arg1[%c0, %c0_0, %c0_1] : memref<8x1x256xf32, #tpu.memory_space<vmem>>, vector<8x1x256xf32>
    %5 = vector.broadcast %4 : vector<8x1x256xf32> to vector<8x16x256xf32>
    %6 = arith.subf %1, %5 : vector<8x16x256xf32>
    %7 = math.absf %6 : vector<8x16x256xf32>
    %cst = arith.constant 1.000000e+00 : f32
    %8 = vector.broadcast %cst : f32 to vector<8x16x256xf32>
    %9 = arith.subf %8, %7 : vector<8x16x256xf32>
    %cst_2 = arith.constant 0.000000e+00 : f32
    %10 = vector.broadcast %cst_2 : f32 to vector<8x16x256xf32>
    %11 = arith.maximumf %10, %9 : vector<8x16x256xf32>
    %c0_3 = arith.constant 0 : index
    %c0_4 = arith.constant 0 : index
    %c0_5 = arith.constant 0 : index
    %12 = vector.load %arg2[%c0_3, %c0_4, %c0_5] : memref<8x1x256xf32, #tpu.memory_space<vmem>>, vector<8x1x256xf32>
    %13 = vector.broadcast %12 : vector<8x1x256xf32> to vector<8x16x256xf32>
    %14 = arith.subf %3, %13 : vector<8x16x256xf32>
    %15 = math.absf %14 : vector<8x16x256xf32>
    %cst_6 = arith.constant 1.000000e+00 : f32
    %16 = vector.broadcast %cst_6 : f32 to vector<8x16x256xf32>
    %17 = arith.subf %16, %15 : vector<8x16x256xf32>
    %cst_7 = arith.constant 0.000000e+00 : f32
    %18 = vector.broadcast %cst_7 : f32 to vector<8x16x256xf32>
    %19 = arith.maximumf %18, %17 : vector<8x16x256xf32>
    %c0_8 = arith.constant 0 : index
    %c0_9 = arith.constant 0 : index
    %c0_10 = arith.constant 0 : index
    %20 = vector.load %arg3[%c0_8, %c0_9, %c0_10] : memref<1x384x128xf32, #tpu.memory_space<vmem>>, vector<1x384x128xf32>
    %21 = vector.shape_cast %20 : vector<1x384x128xf32> to vector<384x128xf32>
    %22 = vector.shape_cast %11 : vector<8x16x256xf32> to vector<128x256xf32>
    %cst_11 = arith.constant dense<0.000000e+00> : vector<384x256xf32>
    %23 = tpu.matmul %21, %22, %cst_11 {dimension_numbers = #tpu.dot_dimension_numbers<[1], [0], [0], [1], [0, 0, 1, 1], [], []>} : vector<384x128xf32>, vector<128x256xf32>, vector<384x256xf32> -> vector<384x256xf32>
    %24 = vector.shape_cast %23 : vector<384x256xf32> to vector<8x3x16x256xf32>
    %25 = vector.shape_cast %19 : vector<8x16x256xf32> to vector<8x1x16x256xf32>
    %26 = vector.broadcast %25 : vector<8x1x16x256xf32> to vector<8x3x16x256xf32>
    %27 = arith.mulf %24, %26 : vector<8x3x16x256xf32>
    %cst_12 = arith.constant dense<0.000000e+00> : vector<8x3x256xf32>
    %28 = vector.multi_reduction <add>, %27, %cst_12 [2] : vector<8x3x16x256xf32> to vector<8x3x256xf32>
    %c0_13 = arith.constant 0 : index
    %c0_14 = arith.constant 0 : index
    %c0_15 = arith.constant 0 : index
    %29 = vector.load %arg4[%c0_13, %c0_14, %c0_15] : memref<8x3x256xf32, #tpu.memory_space<vmem>>, vector<8x3x256xf32>
    tpu.vector_store %arg4[%c0_13, %c0_14, %c0_15], %28 {strides = array<i32>} : memref<8x3x256xf32, #tpu.memory_space<vmem>>, vector<8x3x256xf32>,
    return
  }
  func.func @transform_0(%arg0: i32) -> (i32, i32, i32) {
    %c0_i32 = arith.constant 0 : i32
    %c0_i32_0 = arith.constant 0 : i32
    %c0_i32_1 = arith.constant 0 : i32
    return %arg0, %c0_i32, %c0_i32_0 : i32, i32, i32
  }
  func.func @transform_1(%arg0: i32) -> (i32, i32, i32) {
    %c0_i32 = arith.constant 0 : i32
    %c0_i32_0 = arith.constant 0 : i32
    %c0_i32_1 = arith.constant 0 : i32
    return %arg0, %c0_i32, %c0_i32_0 : i32, i32, i32
  }
  func.func @transform_2(%arg0: i32) -> (i32, i32, i32) {
    %c0_i32 = arith.constant 0 : i32
    %c0_i32_0 = arith.constant 0 : i32
    %c0_i32_1 = arith.constant 0 : i32
    return %arg0, %c0_i32, %c0_i32_0 : i32, i32, i32
  }
  func.func @transform_3(%arg0: i32) -> (i32, i32, i32) {
    %c0_i32 = arith.constant 0 : i32
    %c0_i32_0 = arith.constant 0 : i32
    %c0_i32_1 = arith.constant 0 : i32
    return %arg0, %c0_i32, %c0_i32_0 : i32, i32, i32
  }
}

</mosaic_0001>

<bundles_post_ra>
// kernel: tpu_custom_call.1
= control target key start
LH: loop header
LB: loop body
LE: loop exit
PB: predicated region body
PF: predicated region fallthrough
CT: control target
= control target key end

     0   :  { %8 = vsyncpa [#allocation3], 0  ;;  %s2194_s0 = inlined_call_operand.hbm [shape: f32[8,1,256], index: 0, kind: input, shape index: {}]   ;;  %s2195_s1 = inlined_call_operand.hbm [shape: f32[8,1,256], index: 1, kind: input, shape index: {}]   ;;  %s2196_s2 = inlined_call_operand.hbm [shape: f32[1,384,128], index: 2, kind: input, shape index: {}]   ;;  %s2197_s3 = inlined_call_operand.vmem [shape: f32[8,3,256], index: 3, kind: output, shape index: {}]  }
   0x1   :  { %9 = vsyncpa [#allocation5], 0  ;;  %s1591_s12 = smov [#allocation4]   ;;  %s1592_s14 = smov [#allocation2]  }
   0x2   :  { %s27_s13 = sshll.u32 %s1591_s12, 4  ;;  %s15_s15 = sshll.u32 %s1592_s14, 4  ;;  %s28_s13 = int_to_ptr.vmem [resolvable:$true] %s27_s13  ;;  %s16_s15 = int_to_ptr.vmem [resolvable:$true] %s15_s15 }
   0x3   :  { %s1535_s16 = scalar_lea.vmem %s28_s13, 256  ;;  %p1540_p1 = scmp.lt.s32.totalorder %s28_s13, %s28_s13 }
   0x4   :  { %p1536_p0 = scmp.ne.s32.totalorder %s28_s13, %s1535_s16  ;;  %p1541_p2 = scmp.lt.s32.totalorder %s1535_s16, %s1535_s16 }
   0x6   :  { %p1542_p3 = por %p1541_p2, %p1540_p1 }
   0x8   :  { %p1543_p4 = pnand %p1542_p3, %p1536_p0 }
   0xa   :  { %1546 = shalt.err (!%p1543_p4)
}
   0xb   :  { %s1593_s17 = smov 32   ;;  %s1594_s18 = smov 2  }
   0xc   :  { %33 = dma.hbm_to_vmem [thread:$0]  %s2195_s1, 256, %s28_s13, [#allocation5], %s1593_s17, %s1593_s17, %s1594_s18  }
   0xd   :  { %s1555_s21 = scalar_lea.vmem %s16_s15, 256  ;;  %p1560_p6 = scmp.lt.s32.totalorder %s16_s15, %s16_s15 }
   0xe   :  { %p1556_p5 = scmp.ne.s32.totalorder %s16_s15, %s1555_s21  ;;  %p1561_p7 = scmp.lt.s32.totalorder %s1555_s21, %s1555_s21 }
  0x10   :  { %p1562_p8 = por %p1561_p7, %p1560_p6 }
  0x12   :  { %p1563_p9 = pnand %p1562_p8, %p1556_p5 }
  0x14   :  { %1566 = shalt.err (!%p1563_p9)
}
  0x15   :  { %21 = dma.hbm_to_vmem [thread:$0]  %s2194_s0, 256, %s16_s15, [#allocation3], %s1593_s17, %s1593_s17, %s1594_s18  }
  0x16   :  { %s1595_s24 = smov [#allocation6]  }
  0x17   :  { %s39_s25 = sshll.u32 %s1595_s24, 4  ;;  %s40_s25 = int_to_ptr.vmem [resolvable:$true] %s39_s25 }
  0x18   :  { %s1575_s26 = scalar_lea.vmem %s40_s25, 6144  ;;  %p1580_p11 = scmp.lt.s32.totalorder %s40_s25, %s40_s25 }
  0x19   :  { %p1576_p10 = scmp.ne.s32.totalorder %s40_s25, %s1575_s26  ;;  %p1581_p12 = scmp.lt.s32.totalorder %s1575_s26, %s1575_s26 }
  0x1b   :  { %p1582_p13 = por %p1581_p12, %p1580_p11 }
  0x1d   :  { %p1583_p0 = pnand %p1582_p13, %p1576_p10 }
  0x1f   :  { %1586 = shalt.err (!%p1583_p0)
}
  0x20   :  { %s1596_s1 = smov 128   ;;  %s1597_s27 = smov 8  }
  0x21   :  { %45 = dma.hbm_to_vmem [thread:$0]  %s2196_s2, 6144, %s40_s25, [#allocation5], %s1596_s1, %s1596_s1, %s1597_s27  }
  0x22   :  { %1587 = dma.done.wait [#allocation3], 256  }
  0x23   :  { %1588 = vsyncadd [#allocation3], 4294967040 }
  0x24   :  { %1589 = dma.done.wait [#allocation5], 6400  }
  0x25   :  { %1590 = vsyncadd [#allocation5], 4294960896  ;;  %v55_v0 = vlaneseq  ;;  %v1598_v1 = vmov 0.0   ;;  %v67_v8 = vld [vmem:[#allocation2 + $0xe] sm:$0x3]  ;;  %vm1414_vm0 = vcmask 1041409  }
  0x26   :  { %620 = vmatprep.mubr.f32.mxu0 %v1598_v1  ;;  %764 = vmatprep.mubr.f32.mxu1 %v1598_v1  ;;  %v66_v9 = vld [vmem:[#allocation2 + $0xc] sm:$0x3]  ;;  %v65_v10 = vld [vmem:[#allocation2 + $0xa] sm:$0x3]  ;;  %v64_v15 = vld [vmem:[#allocation2 + $0x8] sm:$0x3] }
  0x27   :  { %v56_v2 = vshrl.u32 %v55_v0, 7  ;;  %v63_v0 = vld [vmem:[#allocation2 + $0x6] sm:$0x3]  ;;  %vm1416_vm1 = vcmask 1045509   ;;  %vm1419_vm2 = vcmask 1042434   ;;  %vm1421_vm3 = vcmask 1046534  }
  0x29   :  { %v57_v3 = vadd.s32 8, %v56_v2  ;;  %v1630_v4 = vsub.s32 1, %v56_v2  ;;  %v1632_v5 = vsub.s32 0, %v56_v2  ;;  %v1634_v6 = vcvt.s32.f32 %v56_v2 }
  0x2b   :  { %v1636_v7 = vcvt.s32.f32 %v57_v3  ;;  %v139_v11 = vrot.slane %v67_v8, %v1630_v4  ;;  %v135_v12 = vrot.slane %v67_v8, %v1632_v5  ;;  %v131_v13 = vrot.slane %v66_v9, %v1630_v4 }
  0x2c   :  { %v127_v14 = vrot.slane %v66_v9, %v1632_v5  ;;  %v123_v16 = vrot.slane %v65_v10, %v1630_v4  ;;  %v119_v17 = vrot.slane %v65_v10, %v1632_v5  ;;  %v1645_v18 = vrot.slane %v64_v15, %v1630_v4 }
  0x2d   :  { %v1648_v19 = vrot.slane %v64_v15, %v1632_v5  ;;  %v187_v20 = vsub.f32 %v1636_v7, %v139_v11  ;;  %v186_v21 = vsub.f32 %v1636_v7, %v135_v12  ;;  %v185_v22 = vsub.f32 %v1634_v6, %v139_v11 }
  0x2e   :  { %v184_v23 = vsub.f32 %v1634_v6, %v135_v12  ;;  %v183_v24 = vsub.f32 %v1636_v7, %v131_v13  ;;  %v182_v25 = vsub.f32 %v1636_v7, %v127_v14  ;;  %v181_v26 = vsub.f32 %v1634_v6, %v131_v13 }
  0x2f   :  { %v180_v27 = vsub.f32 %v1634_v6, %v127_v14  ;;  %v219_v28 = vand.u32 2147483647, %v187_v20  ;;  %v218_v29 = vand.u32 2147483647, %v186_v21  ;;  %v217_v30 = vand.u32 2147483647, %v185_v22 }
  0x30   :  { %v179_v31 = vsub.f32 %v1636_v7, %v123_v16  ;;  %v216_v32 = vand.u32 2147483647, %v184_v23  ;;  %v215_v33 = vand.u32 2147483647, %v183_v24  ;;  %v214_v34 = vand.u32 2147483647, %v182_v25 }
  0x31   :  { %v178_v35 = vsub.f32 %v1636_v7, %v119_v17  ;;  %v251_v36 = vsub.f32 1.0, %v219_v28  ;;  %v250_v37 = vsub.f32 1.0, %v218_v29  ;;  %v249_v38 = vsub.f32 1.0, %v217_v30  ;;  %v62_v22 = vld [vmem:[#allocation2 + $0x4] sm:$0x3] }
  0x32   :  { %v213_v39 = vand.u32 2147483647, %v181_v26  ;;  %v248_v40 = vsub.f32 1.0, %v216_v32  ;;  %v247_v41 = vsub.f32 1.0, %v215_v33  ;;  %v246_v42 = vsub.f32 1.0, %v214_v34 }
  0x33   :  { %v212_v43 = vand.u32 2147483647, %v180_v27  ;;  %v283_v44 = vmax.f32 %v251_v36, 0.0  ;;  %v282_v45 = vmax.f32 %v250_v37, 0.0  ;;  %v281_v46 = vmax.f32 %v249_v38, 0.0 }
  0x34   :  { %v245_v47 = vsub.f32 1.0, %v213_v39  ;;  %v280_v48 = vmax.f32 %v248_v40, 0.0  ;;  %v279_v49 = vmax.f32 %v247_v41, 0.0  ;;  %v278_v50 = vmax.f32 %v246_v42, 0.0  ;;  %v61_v27 = vld [vmem:[#allocation2 + $0x2] sm:$0x3] }
  0x35   :  { %v244_v51 = vsub.f32 1.0, %v212_v43  ;;  %556 = vmatprep.subr.mxu0 %v283_v44  ;;  %1487 = vmatprep.subr.mxu1 %v283_v44  ;;  %v211_v53 = vand.u32 2147483647, %v179_v31  ;;  %v210_v54 = vand.u32 2147483647, %v178_v35  ;;  %v177_v55 = vsub.f32 %v1634_v6, %v123_v16 }
  0x36   :  { %v277_v52 = vmax.f32 %v245_v47, 0.0  ;;  %557 = vmatpush1.msra.mxu0 %v282_v45  ;;  %1503 = vmatpush1.msra.mxu1 %v282_v45  ;;  %v176_v57 = vsub.f32 %v1634_v6, %v119_v17  ;;  %v175_v58 = vsub.f32 %v1636_v7, %v1645_v18  ;;  %v174_v59 = vsub.f32 %v1636_v7, %v1648_v19 }
  0x37   :  { %v276_v56 = vmax.f32 %v244_v51, 0.0  ;;  %558 = vmatprep.subr.mxu0 %v281_v46  ;;  %1488 = vmatprep.subr.mxu1 %v281_v46  ;;  %v243_v60 = vsub.f32 1.0, %v211_v53  ;;  %v242_v61 = vsub.f32 1.0, %v210_v54  ;;  %v209_v62 = vand.u32 2147483647, %v177_v55 }
  0x38   :  { %v173_v63 = vsub.f32 %v1634_v6, %v1645_v18  ;;  %559 = vmatpush1.msra.mxu0 %v280_v48  ;;  %1504 = vmatpush1.msra.mxu1 %v280_v48  ;;  %v208_v2 = vand.u32 2147483647, %v176_v57  ;;  %v207_v3 = vand.u32 2147483647, %v175_v58  ;;  %v206_v8 = vand.u32 2147483647, %v174_v59 }
  0x39   :  { %v172_v9 = vsub.f32 %v1634_v6, %v1648_v19  ;;  %560 = vmatprep.subr.mxu0 %v279_v49  ;;  %1489 = vmatprep.subr.mxu1 %v279_v49  ;;  %v275_v10 = vmax.f32 %v243_v60, 0.0  ;;  %v274_v11 = vmax.f32 %v242_v61, 0.0  ;;  %v241_v12 = vsub.f32 1.0, %v209_v62  ;;  %v60_v48 = vld [vmem:[#allocation2] sm:$0x3] }
  0x3a   :  { %v205_v13 = vand.u32 2147483647, %v173_v63  ;;  %561 = vmatpush1.msra.mxu0 %v278_v50  ;;  %1505 = vmatpush1.msra.mxu1 %v278_v50  ;;  %v240_v14 = vsub.f32 1.0, %v208_v2  ;;  %v239_v15 = vsub.f32 1.0, %v207_v3  ;;  %v238_v16 = vsub.f32 1.0, %v206_v8 }
  0x3b   :  { %v204_v17 = vand.u32 2147483647, %v172_v9  ;;  %562 = vmatprep.subr.mxu0 %v277_v52  ;;  %1490 = vmatprep.subr.mxu1 %v277_v52  ;;  %v273_v18 = vmax.f32 %v241_v12, 0.0  ;;  %v107_v21 = vrot.slane %v63_v0, %v1630_v4  ;;  %v103_v19 = vrot.slane %v63_v0, %v1632_v5 }
  0x3c   :  { %v237_v20 = vsub.f32 1.0, %v205_v13  ;;  %563 = vmatpush1.msra.mxu0 %v276_v56  ;;  %1506 = vmatpush1.msra.mxu1 %v276_v56  ;;  %v272_v23 = vmax.f32 %v240_v14, 0.0  ;;  %v271_v24 = vmax.f32 %v239_v15, 0.0  ;;  %v270_v25 = vmax.f32 %v238_v16, 0.0 }
  0x3d   :  { %v236_v26 = vsub.f32 1.0, %v204_v17  ;;  %564 = vmatprep.subr.mxu0 %v275_v10  ;;  %1491 = vmatprep.subr.mxu1 %v275_v10  ;;  %v171_v29 = vsub.f32 %v1636_v7, %v107_v21  ;;  %v170_v30 = vsub.f32 %v1636_v7, %v103_v19  ;;  %v169_v31 = vsub.f32 %v1634_v6, %v107_v21 }
  0x3e   :  { %v269_v28 = vmax.f32 %v237_v20, 0.0  ;;  %565 = vmatpush1.msra.mxu0 %v274_v11  ;;  %1507 = vmatpush1.msra.mxu1 %v274_v11  ;;  %v168_v33 = vsub.f32 %v1634_v6, %v103_v19  ;;  %v99_v34 = vrot.slane %v62_v22, %v1630_v4  ;;  %v95_v35 = vrot.slane %v62_v22, %v1632_v5 }
  0x3f   :  { %v268_v32 = vmax.f32 %v236_v26, 0.0  ;;  %566 = vmatprep.subr.mxu0 %v273_v18  ;;  %1492 = vmatprep.subr.mxu1 %v273_v18  ;;  %v203_v36 = vand.u32 2147483647, %v171_v29  ;;  %v202_v37 = vand.u32 2147483647, %v170_v30  ;;  %v91_v39 = vrot.slane %v61_v27, %v1630_v4 }
  0x40   :  { %v201_v38 = vand.u32 2147483647, %v169_v31  ;;  %567 = vmatpush1.msra.mxu0 %v272_v23  ;;  %1508 = vmatpush1.msra.mxu1 %v272_v23  ;;  %v200_v40 = vand.u32 2147483647, %v168_v33  ;;  %v167_v41 = vsub.f32 %v1636_v7, %v99_v34  ;;  %v166_v42 = vsub.f32 %v1636_v7, %v95_v35 }
  0x41   :  { %v165_v43 = vsub.f32 %v1634_v6, %v99_v34  ;;  %568 = vmatprep.subr.mxu0 %v271_v24  ;;  %1493 = vmatprep.subr.mxu1 %v271_v24  ;;  %v235_v44 = vsub.f32 1.0, %v203_v36  ;;  %v234_v45 = vsub.f32 1.0, %v202_v37  ;;  %v164_v47 = vsub.f32 %v1634_v6, %v95_v35 }
  0x42   :  { %v233_v46 = vsub.f32 1.0, %v201_v38  ;;  %569 = vmatpush1.msra.mxu0 %v270_v25  ;;  %1509 = vmatpush1.msra.mxu1 %v270_v25  ;;  %v232_v49 = vsub.f32 1.0, %v200_v40  ;;  %v199_v50 = vand.u32 2147483647, %v167_v41  ;;  %v198_v51 = vand.u32 2147483647, %v166_v42 }
  0x43   :  { %v163_v52 = vsub.f32 %v1636_v7, %v91_v39  ;;  %570 = vmatprep.subr.mxu0 %v269_v28  ;;  %1494 = vmatprep.subr.mxu1 %v269_v28  ;;  %v267_v53 = vmax.f32 %v235_v44, 0.0  ;;  %v266_v54 = vmax.f32 %v234_v45, 0.0  ;;  %v197_v56 = vand.u32 2147483647, %v165_v43  ;;  %v508_v42 = vld [vmem:[#allocation6] sm:$0xff]  ;;  %v509_v44 = vld [vmem:[#allocation6 + $0x8] sm:$0xff] }
  0x44   :  { %v265_v55 = vmax.f32 %v233_v46, 0.0  ;;  %571 = vmatpush1.msra.mxu0 %v268_v32  ;;  %1510 = vmatpush1.msra.mxu1 %v268_v32  ;;  %v264_v57 = vmax.f32 %v232_v49, 0.0  ;;  %v231_v58 = vsub.f32 1.0, %v199_v50  ;;  %v230_v59 = vsub.f32 1.0, %v198_v51  ;;  %v532_v43 = vld [vmem:[#allocation6 + $0xc0] sm:$0xff]  ;;  %v533_v45 = vld [vmem:[#allocation6 + $0xc8] sm:$0xff] }
  0x45   :  { %v196_v60 = vand.u32 2147483647, %v164_v47  ;;  %572 = vmatprep.subr.mxu0 %v267_v53  ;;  %1495 = vmatprep.subr.mxu1 %v267_v53  ;;  %v229_v61 = vsub.f32 1.0, %v197_v56  ;;  %v195_v62 = vand.u32 2147483647, %v163_v52  ;;  %v87_v63 = vrot.slane %v61_v27, %v1632_v5  ;;  %v510_v46 = vld [vmem:[#allocation6 + $0x10] sm:$0xff] }
  0x46   :  { %v161_v0 = vsub.f32 %v1634_v6, %v91_v39  ;;  %573 = vmatpush1.msra.mxu0 %v266_v54  ;;  %1511 = vmatpush1.msra.mxu1 %v266_v54  ;;  %v263_v2 = vmax.f32 %v231_v58, 0.0  ;;  %v262_v3 = vmax.f32 %v230_v59, 0.0  ;;  %v83_v9 = vrot.slane %v60_v48, %v1630_v4  ;;  %v534_v47 = vld [vmem:[#allocation6 + $0xd0] sm:$0xff]  ;;  %v535_v49 = vld [vmem:[#allocation6 + $0xd8] sm:$0xff]  ;;  %v512_v50 = vld [vmem:[#allocation6 + $0x20] sm:$0xff] }
  0x47   :  { %v228_v8 = vsub.f32 1.0, %v196_v60  ;;  %574 = vmatprep.subr.mxu0 %v265_v55  ;;  %1496 = vmatprep.subr.mxu1 %v265_v55  ;;  %v261_v10 = vmax.f32 %v229_v61, 0.0  ;;  %v227_v11 = vsub.f32 1.0, %v195_v62  ;;  %v162_v12 = vsub.f32 %v1636_v7, %v87_v63  ;;  %v536_v51 = vld [vmem:[#allocation6 + $0xe0] sm:$0xff]  ;;  %v513_v52 = vld [vmem:[#allocation6 + $0x28] sm:$0xff]  ;;  %v514_v54 = vld [vmem:[#allocation6 + $0x30] sm:$0xff] }
  0x48   :  { %v193_v13 = vand.u32 2147483647, %v161_v0  ;;  %575 = vmatpush1.msra.mxu0 %v264_v57  ;;  %1512 = vmatpush1.msra.mxu1 %v264_v57  ;;  %v160_v15 = vsub.f32 %v1634_v6, %v87_v63  ;;  %v159_v16 = vsub.f32 %v1636_v7, %v83_v9  ;;  %v79_v17 = vrot.slane %v60_v48, %v1632_v5  ;;  %v511_v48 = vld [vmem:[#allocation6 + $0x18] sm:$0xff]  ;;  %v537_v53 = vld [vmem:[#allocation6 + $0xe8] sm:$0xff]  ;;  %v538_v55 = vld [vmem:[#allocation6 + $0xf0] sm:$0xff] }
  0x49   :  { %v260_v14 = vmax.f32 %v228_v8, 0.0  ;;  %576 = vmatprep.subr.mxu0 %v263_v2  ;;  %1497 = vmatprep.subr.mxu1 %v263_v2  ;;  %v259_v18 = vmax.f32 %v227_v11, 0.0  ;;  %v194_v20 = vand.u32 2147483647, %v162_v12  ;;  %v157_v19 = vsub.f32 %v1634_v6, %v83_v9  ;;  %v515_v56 = vld [vmem:[#allocation6 + $0x38] sm:$0xff]  ;;  %v516_v58 = vld [vmem:[#allocation6 + $0x40] sm:$0xff] }
  0x4a   :  { %v225_v21 = vsub.f32 1.0, %v193_v13  ;;  %577 = vmatpush1.msra.mxu0 %v262_v3  ;;  %1513 = vmatpush1.msra.mxu1 %v262_v3  ;;  %v192_v22 = vand.u32 2147483647, %v160_v15  ;;  %v191_v23 = vand.u32 2147483647, %v159_v16  ;;  %v158_v24 = vsub.f32 %v1636_v7, %v79_v17  ;;  %v539_v57 = vld [vmem:[#allocation6 + $0xf8] sm:$0xff] }
  0x4b   :  { %v156_v25 = vsub.f32 %v1634_v6, %v79_v17  ;;  %578 = vmatprep.subr.mxu0 %v261_v10  ;;  %1498 = vmatprep.subr.mxu1 %v261_v10  ;;  %v226_v26 = vsub.f32 1.0, %v194_v20  ;;  %v189_v28 = vand.u32 2147483647, %v157_v19  ;;  %v540_v59 = vld [vmem:[#allocation6 + $0x100] sm:$0xff]  ;;  %v517_v60 = vld [vmem:[#allocation6 + $0x48] sm:$0xff]  ;;  %v518_v62 = vld [vmem:[#allocation6 + $0x50] sm:$0xff] }
  0x4c   :  { %v257_v27 = vmax.f32 %v225_v21, 0.0  ;;  %579 = vmatpush1.msra.mxu0 %v260_v14  ;;  %1514 = vmatpush1.msra.mxu1 %v260_v14  ;;  %v224_v29 = vsub.f32 1.0, %v192_v22  ;;  %v223_v30 = vsub.f32 1.0, %v191_v23  ;;  %v190_v31 = vand.u32 2147483647, %v158_v24  ;;  %v541_v61 = vld [vmem:[#allocation6 + $0x108] sm:$0xff] }
  0x4d   :  { %v188_v32 = vand.u32 2147483647, %v156_v25  ;;  %580 = vmatprep.subr.mxu0 %v259_v18  ;;  %1499 = vmatprep.subr.mxu1 %v259_v18  ;;  %v258_v33 = vmax.f32 %v226_v26, 0.0  ;;  %v221_v34 = vsub.f32 1.0, %v189_v28  ;;  %v542_v63 = vld [vmem:[#allocation6 + $0x110] sm:$0xff]  ;;  %v519_v0 = vld [vmem:[#allocation6 + $0x58] sm:$0xff] }
  0x4e   :  { %v256_v35 = vmax.f32 %v224_v29, 0.0  ;;  %v255_v36 = vmax.f32 %v223_v30, 0.0  ;;  %v222_v37 = vsub.f32 1.0, %v190_v31  ;;  %v543_v2 = vld [vmem:[#allocation6 + $0x118] sm:$0xff]  ;;  %v520_v3 = vld [vmem:[#allocation6 + $0x60] sm:$0xff]  ;;  %v521_v9 = vld [vmem:[#allocation6 + $0x68] sm:$0xff] }
  0x4f   :  { %v220_v38 = vsub.f32 1.0, %v188_v32  ;;  %581 = vmatpush1.msra.mxu0 %v258_v33  ;;  %1515 = vmatpush1.msra.mxu1 %v258_v33  ;;  %v253_v40 = vmax.f32 %v221_v34, 0.0  ;;  %v544_v8 = vld [vmem:[#allocation6 + $0x120] sm:$0xff]  ;;  %v545_v10 = vld [vmem:[#allocation6 + $0x128] sm:$0xff]  ;;  %v522_v11 = vld [vmem:[#allocation6 + $0x70] sm:$0xff] }
  0x50   :  { %582 = vmatprep.subr.mxu0 %v257_v27  ;;  %1500 = vmatprep.subr.mxu1 %v257_v27  ;;  %v254_v39 = vmax.f32 %v222_v37, 0.0  ;;  %v546_v12 = vld [vmem:[#allocation6 + $0x130] sm:$0xff]  ;;  %v523_v13 = vld [vmem:[#allocation6 + $0x78] sm:$0xff]  ;;  %v524_v15 = vld [vmem:[#allocation6 + $0x80] sm:$0xff] }
  0x51   :  { %583 = vmatpush1.msra.mxu0 %v256_v35  ;;  %1516 = vmatpush1.msra.mxu1 %v256_v35  ;;  %v252_v41 = vmax.f32 %v220_v38, 0.0  ;;  %v547_v14 = vld [vmem:[#allocation6 + $0x138] sm:$0xff]  ;;  %v548_v16 = vld [vmem:[#allocation6 + $0x140] sm:$0xff]  ;;  %v525_v17 = vld [vmem:[#allocation6 + $0x88] sm:$0xff] }
  0x52   :  { %584 = vmatprep.subr.mxu0 %v255_v36  ;;  %1501 = vmatprep.subr.mxu1 %v255_v36  ;;  %v549_v18 = vld [vmem:[#allocation6 + $0x148] sm:$0xff]  ;;  %v526_v20 = vld [vmem:[#allocation6 + $0x90] sm:$0xff]  ;;  %v527_v19 = vld [vmem:[#allocation6 + $0x98] sm:$0xff] }
  0x53   :  { %585 = vmatpush1.msra.mxu0 %v254_v39  ;;  %1517 = vmatpush1.msra.mxu1 %v254_v39  ;;  %v550_v21 = vld [vmem:[#allocation6 + $0x150] sm:$0xff]  ;;  %v551_v22 = vld [vmem:[#allocation6 + $0x158] sm:$0xff]  ;;  %v528_v23 = vld [vmem:[#allocation6 + $0xa0] sm:$0xff] }
  0x54   :  { %586 = vmatprep.subr.mxu0 %v253_v40  ;;  %1502 = vmatprep.subr.mxu1 %v253_v40  ;;  %v552_v24 = vld [vmem:[#allocation6 + $0x160] sm:$0xff]  ;;  %v529_v25 = vld [vmem:[#allocation6 + $0xa8] sm:$0xff]  ;;  %v530_v27 = vld [vmem:[#allocation6 + $0xb0] sm:$0xff] }
  0x55   :  { %587 = vmatpush1.msra.mxu0 %v252_v41  ;;  %1518 = vmatpush1.msra.mxu1 %v252_v41  ;;  %v553_v26 = vld [vmem:[#allocation6 + $0x168] sm:$0xff]  ;;  %v554_v28 = vld [vmem:[#allocation6 + $0x170] sm:$0xff]  ;;  %v531_v29 = vld [vmem:[#allocation6 + $0xb8] sm:$0xff] }
  0x56   :  { %621 = vmatmul.mubr.f32.vlgmr.msra.gmra.mxu0 %v508_v42  ;;  %765 = vmatmul.mubr.f32.vlgmr.msra.gmra.mxu1 %v532_v43  ;;  %v555_v30 = vld [vmem:[#allocation6 + $0x178] sm:$0xff]  ;;  %v284_v31 = vld [vmem:[#allocation4] sm:$0x3]  ;;  %v285_v39 = vld [vmem:[#allocation4 + $0x2] sm:$0x3] }
  0x57   :  { %626 = vmatprep.mubr.f32.mxu0 %v1598_v1  ;;  %770 = vmatprep.mubr.f32.mxu1 %v1598_v1  ;;  %v288_v32 = vld [vmem:[#allocation4 + $0x8] sm:$0x3]  ;;  %v303_v33 = vrot.slane %v284_v31, %v1632_v5  ;;  %v307_v35 = vrot.slane %v284_v31, %v1630_v4  ;;  %v311_v41 = vrot.slane %v285_v39, %v1632_v5 }
  0x58   :  { %v335_v34 = vrot.slane %v288_v32, %v1632_v5  ;;  %v339_v38 = vrot.slane %v288_v32, %v1630_v4 }
  0x59   :  { %v380_v36 = vsub.f32 %v1634_v6, %v303_v33  ;;  %v381_v40 = vsub.f32 %v1634_v6, %v307_v35 }
  0x5a   :  { %627 = vmatmul.mubr.f32.gmra.mxu0 %v509_v44  ;;  %771 = vmatmul.mubr.f32.gmra.mxu1 %v533_v45  ;;  %v396_v37 = vsub.f32 %v1634_v6, %v335_v34  ;;  %v397_v45 = vsub.f32 %v1634_v6, %v339_v38 }
  0x5b   :  { %632 = vmatprep.mubr.f32.mxu0 %v1598_v1  ;;  %776 = vmatprep.mubr.f32.mxu1 %v1598_v1  ;;  %v412_v43 = vand.u32 2147483647, %v380_v36 }
  0x5c   :  { %v428_v44 = vand.u32 2147483647, %v396_v37 }
  0x5e   :  { %633 = vmatmul.mubr.f32.gmra.mxu0 %v510_v46  ;;  %777 = vmatmul.mubr.f32.gmra.mxu1 %v534_v47  ;;  %v1751_v46 = vrot.slane %v285_v39, %v1630_v4  ;;  %v413_v47 = vand.u32 2147483647, %v381_v40 }
  0x5f   :  { %638 = vmatprep.mubr.f32.mxu0 %v1598_v1  ;;  %782 = vmatprep.mubr.f32.mxu1 %v1598_v1 }
  0x62   :  { %639 = vmatmul.mubr.f32.gmra.mxu0 %v511_v48  ;;  %783 = vmatmul.mubr.f32.gmra.mxu1 %v535_v49  ;;  %v382_v49 = vsub.f32 %v1636_v7, %v303_v33 }
  0x63   :  { %644 = vmatprep.mubr.f32.mxu0 %v1598_v1  ;;  %788 = vmatprep.mubr.f32.mxu1 %v1598_v1 }
  0x66   :  { %645 = vmatmul.mubr.f32.gmra.mxu0 %v512_v50  ;;  %789 = vmatmul.mubr.f32.gmra.mxu1 %v536_v51  ;;  %v398_v50 = vsub.f32 %v1636_v7, %v335_v34  ;;  %v383_v51 = vsub.f32 %v1636_v7, %v307_v35 }
  0x67   :  { %650 = vmatprep.mubr.f32.mxu0 %v1598_v1  ;;  %794 = vmatprep.mubr.f32.mxu1 %v1598_v1 }
  0x6a   :  { %651 = vmatmul.mubr.f32.gmra.mxu0 %v513_v52  ;;  %795 = vmatmul.mubr.f32.gmra.mxu1 %v537_v53  ;;  %v399_v52 = vsub.f32 %v1636_v7, %v339_v38  ;;  %v384_v53 = vsub.f32 %v1634_v6, %v311_v41  ;;  %v387_v38 = vsub.f32 %v1636_v7, %v1751_v46 }
  0x6b   :  { %656 = vmatprep.mubr.f32.mxu0 %v1598_v1  ;;  %800 = vmatprep.mubr.f32.mxu1 %v1598_v1 }
  0x6e   :  { %657 = vmatmul.mubr.f32.gmra.mxu0 %v514_v54  ;;  %801 = vmatmul.mubr.f32.gmra.mxu1 %v538_v55  ;;  %v444_v55 = vsub.f32 1.0, %v412_v43  ;;  %v291_v43 = vld [vmem:[#allocation4 + $0xe] sm:$0x3] }
  0x6f   :  { %662 = vmatprep.mubr.f32.mxu0 %v1598_v1  ;;  %806 = vmatprep.mubr.f32.mxu1 %v1598_v1 }
  0x72   :  { %663 = vmatmul.mubr.f32.gmra.mxu0 %v515_v56  ;;  %807 = vmatmul.mubr.f32.gmra.mxu1 %v539_v57  ;;  %v460_v56 = vsub.f32 1.0, %v428_v44  ;;  %v429_v57 = vand.u32 2147483647, %v397_v45 }
  0x73   :  { %668 = vmatprep.mubr.f32.mxu0 %v1598_v1  ;;  %812 = vmatprep.mubr.f32.mxu1 %v1598_v1 }
  0x76   :  { %669 = vmatmul.mubr.f32.gmra.mxu0 %v516_v58  ;;  %813 = vmatmul.mubr.f32.gmra.mxu1 %v540_v59  ;;  %v385_v58 = vsub.f32 %v1634_v6, %v1751_v46  ;;  %v445_v59 = vsub.f32 1.0, %v413_v47 }
  0x77   :  { %674 = vmatprep.mubr.f32.mxu0 %v1598_v1  ;;  %818 = vmatprep.mubr.f32.mxu1 %v1598_v1 }
  0x7a   :  { %675 = vmatmul.mubr.f32.gmra.mxu0 %v517_v60  ;;  %819 = vmatmul.mubr.f32.gmra.mxu1 %v541_v61  ;;  %v414_v61 = vand.u32 2147483647, %v382_v49 }
  0x7b   :  { %680 = vmatprep.mubr.f32.mxu0 %v1598_v1  ;;  %824 = vmatprep.mubr.f32.mxu1 %v1598_v1 }
  0x7e   :  { %681 = vmatmul.mubr.f32.gmra.mxu0 %v518_v62  ;;  %825 = vmatmul.mubr.f32.gmra.mxu1 %v542_v63  ;;  %v430_v62 = vand.u32 2147483647, %v398_v50  ;;  %v415_v63 = vand.u32 2147483647, %v383_v51 }
  0x7f   :  { %686 = vmatprep.mubr.f32.mxu0 %v1598_v1  ;;  %830 = vmatprep.mubr.f32.mxu1 %v1598_v1 }
  0x82   :  { %687 = vmatmul.mubr.f32.gmra.mxu0 %v519_v0  ;;  %831 = vmatmul.mubr.f32.gmra.mxu1 %v543_v2  ;;  %v431_v0 = vand.u32 2147483647, %v399_v52  ;;  %v416_v2 = vand.u32 2147483647, %v384_v53  ;;  %v419_v52 = vand.u32 2147483647, %v387_v38 }
  0x83   :  { %692 = vmatprep.mubr.f32.mxu0 %v1598_v1  ;;  %836 = vmatprep.mubr.f32.mxu1 %v1598_v1 }
  0x86   :  { %693 = vmatmul.mubr.f32.gmra.mxu0 %v520_v3  ;;  %837 = vmatmul.mubr.f32.gmra.mxu1 %v544_v8  ;;  %v1766_v8 = vmax.f32 %v444_v55, 0.0 }
  0x87   :  { %698 = vmatprep.mubr.f32.mxu0 %v1598_v1  ;;  %842 = vmatprep.mubr.f32.mxu1 %v1598_v1 }
  0x8a   :  { %699 = vmatmul.mubr.f32.gmra.mxu0 %v521_v9  ;;  %843 = vmatmul.mubr.f32.gmra.mxu1 %v545_v10  ;;  %v1768_v9 = vmax.f32 %v460_v56, 0.0  ;;  %v461_v10 = vsub.f32 1.0, %v429_v57 }
  0x8b   :  { %704 = vmatprep.mubr.f32.mxu0 %v1598_v1  ;;  %848 = vmatprep.mubr.f32.mxu1 %v1598_v1 }
  0x8e   :  { %705 = vmatmul.mubr.f32.gmra.mxu0 %v522_v11  ;;  %849 = vmatmul.mubr.f32.gmra.mxu1 %v546_v12  ;;  %v417_v11 = vand.u32 2147483647, %v385_v58 }
  0x8f   :  { %710 = vmatprep.mubr.f32.mxu0 %v1598_v1  ;;  %854 = vmatprep.mubr.f32.mxu1 %v1598_v1 }
  0x92   :  { %711 = vmatmul.mubr.f32.gmra.mxu0 %v523_v13  ;;  %855 = vmatmul.mubr.f32.gmra.mxu1 %v547_v14  ;;  %v286_v13 = vld [vmem:[#allocation4 + $0x4] sm:$0x3]  ;;  %v290_v14 = vld [vmem:[#allocation4 + $0xc] sm:$0x3] }
  0x93   :  { %716 = vmatprep.mubr.f32.mxu0 %v1598_v1  ;;  %860 = vmatprep.mubr.f32.mxu1 %v1598_v1 }
  0x96   :  { %717 = vmatmul.mubr.f32.gmra.mxu0 %v524_v15  ;;  %861 = vmatmul.mubr.f32.gmra.mxu1 %v548_v16  ;;  %v446_v15 = vsub.f32 1.0, %v414_v61  ;;  %v462_v16 = vsub.f32 1.0, %v430_v62  ;;  %v1817_v62 = vrot.slane %v291_v43, %v1630_v4 }
  0x97   :  { %722 = vmatprep.mubr.f32.mxu0 %v1598_v1  ;;  %866 = vmatprep.mubr.f32.mxu1 %v1598_v1 }
  0x98   :  { %v1780_v31 = vmax.f32 %v446_v15, 0.0  ;;  %v1782_v32 = vmax.f32 %v462_v16, 0.0 }
  0x9a   :  { %723 = vmatmul.mubr.f32.gmra.mxu0 %v525_v17  ;;  %867 = vmatmul.mubr.f32.gmra.mxu1 %v549_v18  ;;  %v447_v17 = vsub.f32 1.0, %v415_v63  ;;  %v386_v18 = vsub.f32 %v1636_v7, %v311_v41 }
  0x9b   :  { %728 = vmatprep.mubr.f32.mxu0 %v1598_v1  ;;  %872 = vmatprep.mubr.f32.mxu1 %v1598_v1 }
  0x9c   :  { %v1784_v33 = vmax.f32 %v447_v17, 0.0  ;;  %v418_v34 = vand.u32 2147483647, %v386_v18 }
  0x9e   :  { %729 = vmatmul.mubr.f32.gmra.mxu0 %v526_v20  ;;  %873 = vmatmul.mubr.f32.gmra.mxu1 %v550_v21  ;;  %v1771_v20 = vmax.f32 %v445_v59, 0.0  ;;  %v463_v21 = vsub.f32 1.0, %v431_v0  ;;  %v450_v50 = vsub.f32 1.0, %v418_v34 }
  0x9f   :  { %734 = vmatprep.mubr.f32.mxu0 %v1598_v1  ;;  %878 = vmatprep.mubr.f32.mxu1 %v1598_v1 }
  0xa0   :  { %v1786_v35 = vmax.f32 %v463_v21, 0.0  ;;  %v409_v21 = vsub.f32 %v1634_v6, %v1817_v62 }
  0xa2   :  { %735 = vmatmul.mubr.f32.gmra.mxu0 %v527_v19  ;;  %879 = vmatmul.mubr.f32.gmra.mxu1 %v551_v22  ;;  %v448_v19 = vsub.f32 1.0, %v416_v2 }
  0xa3   :  { %740 = vmatprep.mubr.f32.mxu0 %v1598_v1  ;;  %884 = vmatprep.mubr.f32.mxu1 %v1598_v1 }
  0xa4   :  { %v1788_v36 = vmax.f32 %v448_v19, 0.0 }
  0xa6   :  { %741 = vmatmul.mubr.f32.gmra.mxu0 %v528_v23  ;;  %885 = vmatmul.mubr.f32.gmra.mxu1 %v552_v24  ;;  %v1773_v23 = vmax.f32 %v461_v10, 0.0  ;;  %v1820_v10 = vmax.f32 %v450_v50, 0.0 }
  0xa7   :  { %746 = vmatprep.mubr.f32.mxu0 %v1598_v1  ;;  %890 = vmatprep.mubr.f32.mxu1 %v1598_v1 }
  0xaa   :  { %747 = vmatmul.mubr.f32.gmra.mxu0 %v529_v25  ;;  %891 = vmatmul.mubr.f32.gmra.mxu1 %v553_v26  ;;  %v319_v25 = vrot.slane %v286_v13, %v1632_v5  ;;  %v351_v26 = vrot.slane %v290_v14, %v1632_v5 }
  0xab   :  { %752 = vmatprep.mubr.f32.mxu0 %v1598_v1  ;;  %896 = vmatprep.mubr.f32.mxu1 %v1598_v1 }
  0xac   :  { %v388_v40 = vsub.f32 %v1634_v6, %v319_v25  ;;  %v404_v41 = vsub.f32 %v1634_v6, %v351_v26  ;;  %v390_v46 = vsub.f32 %v1636_v7, %v319_v25  ;;  %v406_v51 = vsub.f32 %v1636_v7, %v351_v26 }
  0xae   :  { %753 = vmatmul.mubr.f32.gmra.mxu0 %v530_v27  ;;  %897 = vmatmul.mubr.f32.gmra.mxu1 %v554_v28  ;;  %v449_v27 = vsub.f32 1.0, %v417_v11  ;;  %v420_v57 = vand.u32 2147483647, %v388_v40  ;;  %v436_v58 = vand.u32 2147483647, %v404_v41 }
  0xaf   :  { %758 = vmatprep.mubr.f32.mxu0 %v1598_v1  ;;  %902 = vmatprep.mubr.f32.mxu1 %v1598_v1  ;;  %v289_v1 = vld [vmem:[#allocation4 + $0xa] sm:$0x3]  ;;  %v422_v63 = vand.u32 2147483647, %v390_v46  ;;  %v438_v0 = vand.u32 2147483647, %v406_v51 }
  0xb0   :  { %v343_v42 = vrot.slane %v289_v1, %v1632_v5  ;;  %v1754_v48 = vrot.slane %v289_v1, %v1630_v4  ;;  %v1798_v44 = vmax.f32 %v449_v27, 0.0  ;;  %v468_v15 = vsub.f32 1.0, %v436_v58 }
  0xb1   :  { %v454_v19 = vsub.f32 1.0, %v422_v63 }
  0xb2   :  { %759 = vmatmul.mubr.f32.gmra.mxu0 %v531_v29  ;;  %903 = vmatmul.mubr.f32.gmra.mxu1 %v555_v30  ;;  %v400_v54 = vsub.f32 %v1634_v6, %v343_v42  ;;  %v401_v60 = vsub.f32 %v1634_v6, %v1754_v48  ;;  %v402_v24 = vsub.f32 %v1636_v7, %v343_v42  ;;  %v287_v42 = vld [vmem:[#allocation4 + $0x6] sm:$0x3] }
  0xb3   :  { %v323_v29 = vrot.slane %v286_v13, %v1630_v4  ;;  %v355_v30 = vrot.slane %v290_v14, %v1630_v4  ;;  %v403_v1 = vsub.f32 %v1636_v7, %v1754_v48  ;;  %v1808_v53 = vrot.slane %v287_v42, %v1632_v5 }
  0xb4   :  { %v432_v3 = vand.u32 2147483647, %v400_v54  ;;  %v433_v12 = vand.u32 2147483647, %v401_v60  ;;  %v434_v39 = vand.u32 2147483647, %v402_v24  ;;  %v1811_v54 = vrot.slane %v291_v43, %v1632_v5 }
  0xb5   :  { %v389_v47 = vsub.f32 %v1634_v6, %v323_v29  ;;  %v405_v49 = vsub.f32 %v1634_v6, %v355_v30  ;;  %v391_v48 = vsub.f32 %v1636_v7, %v323_v29  ;;  %v1814_v55 = vrot.slane %v287_v42, %v1630_v4 }
  0xb6   :  { %v464_v22 = vsub.f32 1.0, %v432_v3  ;;  %v465_v28 = vsub.f32 1.0, %v433_v12  ;;  %v435_v56 = vand.u32 2147483647, %v403_v1  ;;  %v466_v59 = vsub.f32 1.0, %v434_v39 }
  0xb7   :  { %v421_v60 = vand.u32 2147483647, %v389_v47  ;;  %v437_v61 = vand.u32 2147483647, %v405_v49  ;;  %v423_v2 = vand.u32 2147483647, %v391_v48  ;;  %v407_v3 = vsub.f32 %v1636_v7, %v355_v30 }
  0xb8   :  { %v1790_v37 = vmax.f32 %v464_v22, 0.0  ;;  %v1800_v45 = vmax.f32 %v465_v28, 0.0  ;;  %v392_v5 = vsub.f32 %v1634_v6, %v1808_v53  ;;  %v408_v11 = vsub.f32 %v1634_v6, %v1811_v54 }
  0xb9   :  { %v393_v12 = vsub.f32 %v1634_v6, %v1814_v55  ;;  %v451_v13 = vsub.f32 1.0, %v419_v52  ;;  %v467_v14 = vsub.f32 1.0, %v435_v56  ;;  %v452_v4 = vsub.f32 1.0, %v420_v57 }
  0xba   :  { %v1828_v16 = vmax.f32 %v466_v59, 0.0  ;;  %v453_v17 = vsub.f32 1.0, %v421_v60  ;;  %v469_v18 = vsub.f32 1.0, %v437_v61  ;;  %v470_v22 = vsub.f32 1.0, %v438_v0 }
  0xbb   :  { %v455_v24 = vsub.f32 1.0, %v423_v2  ;;  %v439_v25 = vand.u32 2147483647, %v407_v3  ;;  %v424_v28 = vand.u32 2147483647, %v392_v5  ;;  %v1832_v34 = vmax.f32 %v451_v13, 0.0 }
  0xbc   :  { %v440_v29 = vand.u32 2147483647, %v408_v11  ;;  %v425_v30 = vand.u32 2147483647, %v393_v12  ;;  %v1834_v38 = vmax.f32 %v467_v14, 0.0  ;;  %v1836_v39 = vmax.f32 %v452_v4, 0.0 }
  0xbd   :  { %v1838_v1 = vmax.f32 %v468_v15, 0.0  ;;  %v1840_v6 = vmax.f32 %v453_v17, 0.0  ;;  %v1842_v42 = vmax.f32 %v469_v18, 0.0  ;;  %v441_v43 = vand.u32 2147483647, %v409_v21 }
  0xbe   :  { %v394_v47 = vsub.f32 %v1636_v7, %v1808_v53  ;;  %v1846_v49 = vmax.f32 %v454_v19, 0.0  ;;  %v1848_v50 = vmax.f32 %v470_v22, 0.0  ;;  %v1850_v46 = vmax.f32 %v455_v24, 0.0 }
  0xbf   :  { %v471_v51 = vsub.f32 1.0, %v439_v25  ;;  %v456_v56 = vsub.f32 1.0, %v424_v28  ;;  %v472_v57 = vsub.f32 1.0, %v440_v29  ;;  %v457_v58 = vsub.f32 1.0, %v425_v30 }
  0xc0   :  { %v410_v59 = vsub.f32 %v1636_v7, %v1811_v54  ;;  %v473_v11 = vsub.f32 1.0, %v441_v43  ;;  %v1860_v12 = vand.u32 2147483647, %v394_v47  ;;  %v395_v43 = vsub.f32 %v1636_v7, %v1814_v55 }
  0xc1   :  { %v1864_v18 = vmax.f32 %v471_v51, 0.0  ;;  %v1866_v21 = vmax.f32 %v456_v56, 0.0  ;;  %v1868_v19 = vmax.f32 %v472_v57, 0.0  ;;  %v1872_v30 = vmax.f32 %v457_v58, 0.0 }
  0xc2   :  { %v1870_v22 = vand.u32 2147483647, %v410_v59 }
  0xc3   :  { %2202 = vst [vmem:[#allocation9_spill] sm:$0xff] %v1866_v21  ;;  %2203 = vst [vmem:[#allocation10_spill] sm:$0xff] %v1868_v19 }
  0xc4   :  { %2204 = vst [vmem:[#allocation11_spill] sm:$0xff] %v1872_v30 }
 0x116   :  { %v622_v26 = vpop.f32.mrf.mxu0  ;;  %v766_v27 = vpop.f32.mrf.mxu1 }
 0x117   :  { %v909_v60 = vmul.f32 %v622_v26, %v1766_v8  ;;  %v957_v61 = vmul.f32 %v766_v27, %v1768_v9 }
 0x118   :  { %v624_v40 = vpop.f32.mrf.mxu0  ;;  %v768_v41 = vpop.f32.mrf.mxu1 }
 0x119   :  { %v910_v0 = vmul.f32 %v624_v40, %v1771_v20  ;;  %v958_v2 = vmul.f32 %v768_v41, %v1773_v23  ;;  %v1874_v40 = vmax.f32 %v473_v11, 0.0 }
 0x11a   :  { %v628_v48 = vpop.f32.mrf.mxu0  ;;  %v772_v52 = vpop.f32.mrf.mxu1 }
 0x11b   :  { %v911_v53 = vmul.f32 %v628_v48, %v1780_v31  ;;  %v959_v63 = vmul.f32 %v772_v52, %v1782_v32  ;;  %2205 = vst [vmem:[#allocation12_spill] sm:$0xff] %v1874_v40 }
 0x11c   :  { %v630_v3 = vpop.f32.mrf.mxu0  ;;  %v774_v5 = vpop.f32.mrf.mxu1 }
 0x11d   :  { %v1005_v13 = vadd.f32 %v911_v53, %v909_v60  ;;  %v1173_v14 = vadd.f32 %v959_v63, %v957_v61  ;;  %v912_v54 = vmul.f32 %v630_v3, %v1784_v33  ;;  %v960_v4 = vmul.f32 %v774_v5, %v1786_v35 }
 0x11e   :  { %v634_v15 = vpop.f32.mrf.mxu0  ;;  %v778_v17 = vpop.f32.mrf.mxu1  ;;  %v411_v61 = vsub.f32 %v1636_v7, %v1817_v62 }
 0x11f   :  { %v1006_v24 = vrot.slane %v1005_v13, 4  ;;  %v1174_v25 = vrot.slane %v1173_v14, 4  ;;  %v1012_v26 = vadd.f32 %v912_v54, %v910_v0  ;;  %v1180_v27 = vadd.f32 %v960_v4, %v958_v2 }
 0x120   :  { %v636_v28 = vpop.f32.mrf.mxu0  ;;  %v780_v29 = vpop.f32.mrf.mxu1  ;;  %v913_v56 = vmul.f32 %v634_v15, %v1766_v8  ;;  %v961_v57 = vmul.f32 %v778_v17, %v1768_v9 }
 0x121   :  { %v1007_v47 = vadd.f32 %v1006_v24, %v1005_v13  ;;  %v1175_v51 = vadd.f32 %v1174_v25, %v1173_v14  ;;  %v1013_v48 = vrot.slane %v1012_v26, 4  ;;  %v1181_v52 = vrot.slane %v1180_v27, 4 }
 0x122   :  { %v640_v59 = vpop.f32.mrf.mxu0  ;;  %v784_v60 = vpop.f32.mrf.mxu1  ;;  %v914_v55 = vmul.f32 %v636_v28, %v1771_v20  ;;  %v962_v3 = vmul.f32 %v780_v29, %v1773_v23 }
 0x123   :  { %v1008_v53 = vrot.slane %v1007_v47, 2  ;;  %v1176_v63 = vrot.slane %v1175_v51, 2  ;;  %v1014_v0 = vadd.f32 %v1013_v48, %v1012_v26  ;;  %v1182_v2 = vadd.f32 %v1181_v52, %v1180_v27 }
 0x124   :  { %v915_v5 = vmul.f32 %v640_v59, %v1780_v31  ;;  %v963_v11 = vmul.f32 %v784_v60, %v1782_v32  ;;  %v642_v13 = vpop.f32.mrf.mxu0  ;;  %v786_v14 = vpop.f32.mrf.mxu1 }
 0x125   :  { %v1009_v54 = vadd.f32 %v1008_v53, %v1007_v47  ;;  %v1177_v4 = vadd.f32 %v1176_v63, %v1175_v51  ;;  %v1015_v15 = vrot.slane %v1014_v0, 2  ;;  %v1183_v17 = vrot.slane %v1182_v2, 2 }
 0x126   :  { %v1019_v24 = vadd.f32 %v915_v5, %v913_v56  ;;  %v1187_v7 = vadd.f32 %v963_v11, %v961_v57  ;;  %v916_v62 = vmul.f32 %v642_v13, %v1784_v33  ;;  %v964_v25 = vmul.f32 %v786_v14, %v1786_v35  ;;  %v646_v26 = vpop.f32.mrf.mxu0  ;;  %v790_v27 = vpop.f32.mrf.mxu1 }
 0x127   :  { %v1010_v28 = vrot.slane %v1009_v54, 1  ;;  %v1178_v29 = vrot.slane %v1177_v4, 1  ;;  %v1016_v48 = vadd.f32 %v1015_v15, %v1014_v0  ;;  %v1184_v52 = vadd.f32 %v1183_v17, %v1182_v2 }
 0x128   :  { %v1020_v59 = vrot.slane %v1019_v24, 4  ;;  %v1188_v60 = vrot.slane %v1187_v7, 4  ;;  %v1026_v58 = vadd.f32 %v916_v62, %v914_v55  ;;  %v1194_v41 = vadd.f32 %v964_v25, %v962_v3  ;;  %v648_v47 = vpop.f32.mrf.mxu0  ;;  %v792_v51 = vpop.f32.mrf.mxu1 }
 0x129   :  { %v1017_v53 = vrot.slane %v1016_v48, 1  ;;  %v1185_v63 = vrot.slane %v1184_v52, 1  ;;  %v1890_v56 = vand.u32 2147483647, %v395_v43  ;;  %v1892_v57 = vand.u32 2147483647, %v411_v61 }
 0x12a   :  { %v1021_v5 = vadd.f32 %v1020_v59, %v1019_v24  ;;  %v1189_v11 = vadd.f32 %v1188_v60, %v1187_v7  ;;  %v1027_v13 = vrot.slane %v1026_v58, 4  ;;  %v1195_v14 = vrot.slane %v1194_v41, 4  ;;  %v652_v40 = vpop.f32.mrf.mxu0  ;;  %v796_v30 = vpop.f32.mrf.mxu1 }
 0x12b   :  { %v1894_v0 = vadd.f32 %v1010_v28, %v1009_v54  ;;  %v1896_v2 = vadd.f32 %v1178_v29, %v1177_v4  ;;  %v1898_v55 = vadd.f32 %v1017_v53, %v1016_v48  ;;  %v1900_v3 = vadd.f32 %v1185_v63, %v1184_v52 }
 0x12c   :  { %v1022_v15 = vrot.slane %v1021_v5, 2  ;;  %v1190_v17 = vrot.slane %v1189_v11, 2  ;;  %v1028_v43 = vadd.f32 %v1027_v13, %v1026_v58  ;;  %v1196_v62 = vadd.f32 %v1195_v14, %v1194_v41  ;;  %v654_v61 = vpop.f32.mrf.mxu0  ;;  %v798_v25 = vpop.f32.mrf.mxu1 }
 0x12d   :  { %v917_v24 = vmul.f32 %v646_v26, %v1766_v8  ;;  %v965_v7 = vmul.f32 %v790_v27, %v1768_v9  ;;  %v918_v59 = vmul.f32 %v648_v47, %v1771_v20  ;;  %v966_v54 = vmul.f32 %v792_v51, %v1773_v23 }
 0x12e   :  { %v1023_v4 = vadd.f32 %v1022_v15, %v1021_v5  ;;  %v1191_v28 = vadd.f32 %v1190_v17, %v1189_v11  ;;  %v1029_v29 = vrot.slane %v1028_v43, 2  ;;  %v1197_v48 = vrot.slane %v1196_v62, 2  ;;  %v658_v52 = vpop.f32.mrf.mxu0  ;;  %v802_v60 = vpop.f32.mrf.mxu1 }
 0x12f   :  { %v919_v53 = vmul.f32 %v652_v40, %v1780_v31  ;;  %v967_v41 = vmul.f32 %v796_v30, %v1782_v32  ;;  %v920_v58 = vmul.f32 %v654_v61, %v1784_v33  ;;  %v968_v8 = vmul.f32 %v798_v25, %v1786_v35 }
 0x130   :  { %v1024_v26 = vrot.slane %v1023_v4, 1  ;;  %v1192_v9 = vrot.slane %v1191_v28, 1  ;;  %v1030_v27 = vadd.f32 %v1029_v29, %v1028_v43  ;;  %v1198_v20 = vadd.f32 %v1197_v48, %v1196_v62  ;;  %v660_v23 = vpop.f32.mrf.mxu0  ;;  %v804_v47 = vpop.f32.mrf.mxu1 }
 0x131   :  { %v1033_v51 = vadd.f32 %v919_v53, %v917_v24  ;;  %v1201_v63 = vadd.f32 %v967_v41, %v965_v7  ;;  %v1040_v5 = vadd.f32 %v920_v58, %v918_v59  ;;  %v1208_v11 = vadd.f32 %v968_v8, %v966_v54 }
 0x132   :  { %v1389_v31 = vcombine.low %v1894_v0, %v1898_v55  ;;  %v1401_v32 = vcombine.low %v1896_v2, %v1900_v3  ;;  %v1031_v33 = vrot.slane %v1030_v27, 1  ;;  %v1199_v30 = vrot.slane %v1198_v20, 1  ;;  %v664_v35 = vpop.f32.mrf.mxu0  ;;  %v808_v40 = vpop.f32.mrf.mxu1 }
 0x133   :  { %v1034_v13 = vrot.slane %v1033_v51, 4  ;;  %v1202_v14 = vrot.slane %v1201_v63, 4  ;;  %v1041_v15 = vrot.slane %v1040_v5, 4  ;;  %v1209_v17 = vrot.slane %v1208_v11, 4 }
 0x134   :  { %v1025_v43 = vadd.f32 %v1024_v26, %v1023_v4  ;;  %v1193_v62 = vadd.f32 %v1192_v9, %v1191_v28  ;;  %v1032_v61 = vadd.f32 %v1031_v33, %v1030_v27  ;;  %v1200_v25 = vadd.f32 %v1199_v30, %v1198_v20  ;;  %v666_v24 = vpop.f32.mrf.mxu0  ;;  %v810_v7 = vpop.f32.mrf.mxu1 }
 0x135   :  { %v1035_v59 = vadd.f32 %v1034_v13, %v1033_v51  ;;  %v1203_v0 = vadd.f32 %v1202_v14, %v1201_v63  ;;  %v1042_v55 = vadd.f32 %v1041_v15, %v1040_v5  ;;  %v1210_v54 = vadd.f32 %v1209_v17, %v1208_v11 }
 0x136   :  { %v1390_v2 = vcombine.low %v1025_v43, %v1032_v61  ;;  %v1402_v3 = vcombine.low %v1193_v62, %v1200_v25  ;;  %v921_v29 = vmul.f32 %v658_v52, %v1788_v36  ;;  %v969_v48 = vmul.f32 %v802_v60, %v1790_v37  ;;  %v670_v53 = vpop.f32.mrf.mxu0  ;;  %v814_v41 = vpop.f32.mrf.mxu1 }
 0x137   :  { %v1036_v58 = vrot.slane %v1035_v59, 2  ;;  %v1204_v4 = vrot.slane %v1203_v0, 2  ;;  %v1043_v28 = vrot.slane %v1042_v55, 2  ;;  %v1211_v8 = vrot.slane %v1210_v54, 2 }
 0x138   :  { %v1413_v26 = vrot.slane %v1390_v2, 7  ;;  %v1441_v9 = vrot.slane %v1402_v3, 7  ;;  %v923_v27 = vmul.f32 %v664_v35, %v1820_v10  ;;  %v971_v20 = vmul.f32 %v808_v40, %v1828_v16  ;;  %v1918_v51 = vpop.f32.mrf.mxu0  ;;  %v1920_v63 = vpop.f32.mrf.mxu1 }
 0x139   :  { %v1037_v5 = vadd.f32 %v1036_v58, %v1035_v59  ;;  %v1205_v52 = vadd.f32 %v1204_v4, %v1203_v0  ;;  %v1044_v11 = vadd.f32 %v1043_v28, %v1042_v55  ;;  %v1212_v60 = vadd.f32 %v1211_v8, %v1210_v54 }
 0x13a   :  { %v922_v33 = vmul.f32 %v660_v23, %v1798_v44  ;;  %v970_v30 = vmul.f32 %v804_v47, %v1800_v45  ;;  %v1047_v13 = vadd.f32 %v923_v27, %v921_v29  ;;  %v1215_v14 = vadd.f32 %v971_v20, %v969_v48  ;;  %v676_v15 = vpop.f32.mrf.mxu0  ;;  %v820_v35 = vpop.f32.mrf.mxu1 }
 0x13b   :  { %v1415_v40 = vsel %vm1414_vm0, %v1413_v26, %v1389_v31  ;;  %v1442_v17 = vsel %vm1414_vm0, %v1441_v9, %v1401_v32  ;;  %v1038_v43 = vrot.slane %v1037_v5, 1  ;;  %v1206_v62 = vrot.slane %v1205_v52, 1 }
 0x13c   :  { %v1045_v61 = vrot.slane %v1044_v11, 1  ;;  %v1213_v25 = vrot.slane %v1212_v60, 1  ;;  %v1048_v59 = vrot.slane %v1047_v13, 4  ;;  %v1216_v0 = vrot.slane %v1215_v14, 4  ;;  %v678_v55 = vpop.f32.mrf.mxu0  ;;  %v822_v54 = vpop.f32.mrf.mxu1 }
 0x13d   :  { %v1039_v2 = vadd.f32 %v1038_v43, %v1037_v5  ;;  %v1207_v23 = vadd.f32 %v1206_v62, %v1205_v52  ;;  %v924_v47 = vmul.f32 %v666_v24, %v1832_v34  ;;  %v972_v3 = vmul.f32 %v810_v7, %v1834_v38 }
 0x13e   :  { %v1046_v29 = vadd.f32 %v1045_v61, %v1044_v11  ;;  %v1214_v48 = vadd.f32 %v1213_v25, %v1212_v60  ;;  %v1049_v58 = vadd.f32 %v1048_v59, %v1047_v13  ;;  %v1217_v31 = vadd.f32 %v1216_v0, %v1215_v14  ;;  %v682_v4 = vpop.f32.mrf.mxu0  ;;  %v826_v32 = vpop.f32.mrf.mxu1 }
 0x13f   :  { %v1417_v28 = vsel %vm1416_vm1, %v1413_v26, %v1415_v40  ;;  %v1443_v8 = vsel %vm1416_vm1, %v1441_v9, %v1442_v17  ;;  %v1054_v27 = vadd.f32 %v924_v47, %v922_v33  ;;  %v1222_v20 = vadd.f32 %v972_v3, %v970_v30 }
 0x140   :  { %v1391_v19 = vcombine.low %v1039_v2, %v1046_v29  ;;  %v1403_v21 = vcombine.low %v1207_v23, %v1214_v48  ;;  %v1050_v5 = vrot.slane %v1049_v58, 2  ;;  %v1218_v52 = vrot.slane %v1217_v31, 2  ;;  %v684_v43 = vpop.f32.mrf.mxu0  ;;  %v828_v24 = vpop.f32.mrf.mxu1 }
 0x141   :  { %v1055_v62 = vrot.slane %v1054_v27, 4  ;;  %v1223_v7 = vrot.slane %v1222_v20, 4  ;;  %v925_v11 = vmul.f32 %v670_v53, %v1788_v36  ;;  %v973_v60 = vmul.f32 %v814_v41, %v1790_v37 }
 0x142   :  { %v1418_v13 = vrot.slane %v1391_v19, 6  ;;  %v1444_v14 = vrot.slane %v1403_v21, 6  ;;  %v1051_v61 = vadd.f32 %v1050_v5, %v1049_v58  ;;  %v1219_v26 = vadd.f32 %v1218_v52, %v1217_v31  ;;  %v688_v40 = vpop.f32.mrf.mxu0  ;;  %v832_v9 = vpop.f32.mrf.mxu1 }
 0x143   :  { %v1056_v33 = vadd.f32 %v1055_v62, %v1054_v27  ;;  %v1224_v30 = vadd.f32 %v1223_v7, %v1222_v20  ;;  %v927_v17 = vmul.f32 %v676_v15, %v1820_v10  ;;  %v975_v25 = vmul.f32 %v820_v35, %v1828_v16 }
 0x144   :  { %v1420_v59 = vsel %vm1419_vm2, %v1418_v13, %v1417_v28  ;;  %v1445_v0 = vsel %vm1419_vm2, %v1444_v14, %v1443_v8  ;;  %v1052_v2 = vrot.slane %v1051_v61, 1  ;;  %v1220_v53 = vrot.slane %v1219_v26, 1  ;;  %v690_v23 = vpop.f32.mrf.mxu0  ;;  %v834_v41 = vpop.f32.mrf.mxu1 }
 0x145   :  { %v1422_v21 = vsel %vm1421_vm3, %v1418_v13, %v1420_v59  ;;  %v1446_v19 = vsel %vm1421_vm3, %v1444_v14, %v1445_v0  ;;  %v1057_v47 = vrot.slane %v1056_v33, 2  ;;  %v1225_v3 = vrot.slane %v1224_v30, 2 }
 0x146   :  { %1473 = vst [vmem:[%s2197_s3] sm:$0x77] %v1422_v21  ;;  %1477 = vst [vmem:[%s2197_s3 + $0x20] sm:$0x77] %v1446_v19  ;;  %v926_v15 = vmul.f32 %v1918_v51, %v1798_v44  ;;  %v974_v35 = vmul.f32 %v1920_v63, %v1800_v45  ;;  %v1061_v29 = vadd.f32 %v927_v17, %v925_v11  ;;  %v1948_v58 = vpop.f32.mrf.mxu0  ;;  %v1950_v31 = vpop.f32.mrf.mxu1 }
 0x147   :  { %v1229_v48 = vadd.f32 %v975_v25, %v973_v60  ;;  %v1058_v28 = vadd.f32 %v1057_v47, %v1056_v33  ;;  %v1226_v8 = vadd.f32 %v1225_v3, %v1224_v30  ;;  %v928_v27 = vmul.f32 %v678_v55, %v1832_v34 }
 0x148   :  { %v976_v20 = vmul.f32 %v822_v54, %v1834_v38  ;;  %v1954_v5 = vadd.f32 %v1052_v2, %v1051_v61  ;;  %v1956_v52 = vadd.f32 %v1220_v53, %v1219_v26  ;;  %v1062_v51 = vrot.slane %v1061_v29, 4  ;;  %v1958_v7 = vpop.f32.mrf.mxu0  ;;  %v1960_v63 = vpop.f32.mrf.mxu1 }
 0x149   :  { %v1230_v62 = vrot.slane %v1229_v48, 4  ;;  %v1059_v11 = vrot.slane %v1058_v28, 1  ;;  %v1227_v60 = vrot.slane %v1226_v8, 1  ;;  %v1068_v13 = vadd.f32 %v928_v27, %v926_v15 }
 0x14a   :  { %v1236_v14 = vadd.f32 %v976_v20, %v974_v35  ;;  %v1063_v33 = vadd.f32 %v1062_v51, %v1061_v29  ;;  %v929_v55 = vmul.f32 %v682_v4, %v1788_v36  ;;  %v977_v54 = vmul.f32 %v826_v32, %v1790_v37  ;;  %v1964_v61 = vpop.f32.mrf.mxu0  ;;  %v1966_v26 = vpop.f32.mrf.mxu1 }
 0x14b   :  { %v1231_v30 = vadd.f32 %v1230_v62, %v1229_v48  ;;  %v1069_v17 = vrot.slane %v1068_v13, 4  ;;  %v930_v59 = vmul.f32 %v684_v43, %v1798_v44  ;;  %v978_v0 = vmul.f32 %v828_v24, %v1800_v45 }
 0x14c   :  { %v1237_v25 = vrot.slane %v1236_v14, 4  ;;  %v1064_v2 = vrot.slane %v1063_v33, 2  ;;  %v931_v21 = vmul.f32 %v688_v40, %v1820_v10  ;;  %v979_v19 = vmul.f32 %v832_v9, %v1828_v16  ;;  %v1972_v47 = vpop.f32.mrf.mxu0  ;;  %v1974_v36 = vpop.f32.mrf.mxu1 }
 0x14d   :  { %v1232_v53 = vrot.slane %v1231_v30, 2  ;;  %v1976_v37 = vadd.f32 %v1059_v11, %v1058_v28  ;;  %v1978_v4 = vadd.f32 %v1227_v60, %v1226_v8  ;;  %v1070_v32 = vadd.f32 %v1069_v17, %v1068_v13 }
 0x14e   :  { %v1238_v3 = vadd.f32 %v1237_v25, %v1236_v14  ;;  %v1065_v15 = vadd.f32 %v1064_v2, %v1063_v33  ;;  %v1075_v43 = vadd.f32 %v931_v21, %v929_v55  ;;  %v1243_v45 = vadd.f32 %v979_v19, %v977_v54  ;;  %v1980_v24 = vpop.f32.mrf.mxu0  ;;  %v1982_v35 = vpop.f32.mrf.mxu1 }
 0x14f   :  { %v1233_v44 = vadd.f32 %v1232_v53, %v1231_v30  ;;  %v1071_v10 = vrot.slane %v1070_v32, 2  ;;  %v932_v40 = vmul.f32 %v690_v23, %v1832_v34  ;;  %v980_v9 = vmul.f32 %v834_v41, %v1834_v38 }
 0x150   :  { %v1239_v16 = vrot.slane %v1238_v3, 2  ;;  %v1066_v29 = vrot.slane %v1065_v15, 1  ;;  %v1076_v28 = vrot.slane %v1075_v43, 4  ;;  %v1244_v8 = vrot.slane %v1243_v45, 4  ;;  %v1986_v27 = vpop.f32.mrf.mxu0  ;;  %v1988_v20 = vpop.f32.mrf.mxu1 }
 0x151   :  { %v1234_v48 = vrot.slane %v1233_v44, 1  ;;  %v1072_v51 = vadd.f32 %v1071_v10, %v1070_v32  ;;  %v1082_v11 = vadd.f32 %v932_v40, %v930_v59  ;;  %v1250_v60 = vadd.f32 %v980_v9, %v978_v0 }
 0x152   :  { %v1240_v62 = vadd.f32 %v1239_v16, %v1238_v3  ;;  %v1392_v13 = vcombine.low %v1954_v5, %v1976_v37  ;;  %v1404_v34 = vcombine.low %v1956_v52, %v1978_v4  ;;  %v1077_v23 = vadd.f32 %v1076_v28, %v1075_v43  ;;  %v1994_v41 = vpop.f32.mrf.mxu0  ;;  %v1996_v14 = vpop.f32.mrf.mxu1 }
 0x153   :  { %v1245_v38 = vadd.f32 %v1244_v8, %v1243_v45  ;;  %v1073_v33 = vrot.slane %v1072_v51, 1  ;;  %v1083_v55 = vrot.slane %v1082_v11, 4  ;;  %v1251_v54 = vrot.slane %v1250_v60, 4 }
 0x154   :  { %v1241_v30 = vrot.slane %v1240_v62, 1  ;;  %v1067_v17 = vadd.f32 %v1066_v29, %v1065_v15  ;;  %v1235_v25 = vadd.f32 %v1234_v48, %v1233_v44  ;;  %v1078_v59 = vrot.slane %v1077_v23, 2  ;;  %v1998_v2 = vpop.f32.mrf.mxu0  ;;  %v2000_v5 = vpop.f32.mrf.mxu1 }
 0x155   :  { %v1246_v0 = vrot.slane %v1245_v38, 2  ;;  %v1074_v53 = vadd.f32 %v1073_v33, %v1072_v51  ;;  %v1084_v21 = vadd.f32 %v1083_v55, %v1082_v11  ;;  %v1252_v19 = vadd.f32 %v1251_v54, %v1250_v60 }
 0x156   :  { %v1242_v52 = vadd.f32 %v1241_v30, %v1240_v62  ;;  %v1079_v37 = vadd.f32 %v1078_v59, %v1077_v23  ;;  %v933_v32 = vmul.f32 %v1948_v58, %v1836_v39  ;;  %v981_v3 = vmul.f32 %v1950_v31, %v1838_v1  ;;  %v2006_v15 = vpop.f32.mrf.mxu0  ;;  %v2008_v44 = vpop.f32.mrf.mxu1 }
 0x157   :  { %v1247_v4 = vadd.f32 %v1246_v0, %v1245_v38  ;;  %v1393_v43 = vcombine.low %v1067_v17, %v1074_v53  ;;  %v1085_v10 = vrot.slane %v1084_v21, 2  ;;  %v1253_v16 = vrot.slane %v1252_v19, 2 }
 0x158   :  { %v1405_v45 = vcombine.low %v1235_v25, %v1242_v52  ;;  %v1080_v40 = vrot.slane %v1079_v37, 1  ;;  %v935_v29 = vmul.f32 %v1964_v61, %v1846_v49  ;;  %v983_v48 = vmul.f32 %v1966_v26, %v1848_v50  ;;  %v2014_v58 = vpop.f32.mrf.mxu0  ;;  %v2016_v28 = vpop.f32.mrf.mxu1 }
 0x159   :  { %v1248_v9 = vrot.slane %v1247_v4, 1  ;;  %v1423_v31 = vrot.slane %v1393_v43, 7  ;;  %v1086_v51 = vadd.f32 %v1085_v10, %v1084_v21  ;;  %v1254_v62 = vadd.f32 %v1253_v16, %v1252_v19 }
 0x15a   :  { %v1447_v8 = vrot.slane %v1405_v45, 7  ;;  %v934_v11 = vmul.f32 %v1958_v7, %v1840_v6  ;;  %v982_v60 = vmul.f32 %v1960_v63, %v1842_v42  ;;  %v1089_v23 = vadd.f32 %v935_v29, %v933_v32  ;;  %v2022_v61 = vpop.f32.mrf.mxu0  ;;  %v2024_v33 = vpop.f32.mrf.mxu1 }
 0x15b   :  { %v1257_v38 = vadd.f32 %v983_v48, %v981_v3  ;;  %v1081_v26 = vadd.f32 %v1080_v40, %v1079_v37  ;;  %v1249_v30 = vadd.f32 %v1248_v9, %v1247_v4  ;;  %v1087_v55 = vrot.slane %v1086_v51, 1 }
 0x15c   :  { %v1255_v54 = vrot.slane %v1254_v62, 1  ;;  %v1424_v17 = vsel %vm1414_vm0, %v1423_v31, %v1392_v13  ;;  %v1448_v25 = vsel %vm1414_vm0, %v1447_v8, %v1404_v34  ;;  %v1090_v59 = vrot.slane %v1089_v23, 4  ;;  %v2028_v7 = vpop.f32.mrf.mxu0  ;;  %v2030_v53 = vpop.f32.mrf.mxu1 }
 0x15d   :  { %v1258_v0 = vrot.slane %v1257_v38, 4  ;;  %v1088_v63 = vadd.f32 %v1087_v55, %v1086_v51  ;;  %v936_v21 = vmul.f32 %v1972_v47, %v1850_v46  ;;  %v984_v19 = vmul.f32 %v1974_v36, %v1864_v18 }
 0x15e   :  { %v1256_v52 = vadd.f32 %v1255_v54, %v1254_v62  ;;  %v1091_v37 = vadd.f32 %v1090_v59, %v1089_v23  ;;  %v459_v13 = vsub.f32 1.0, %v1890_v56  ;;  %v475_v34 = vsub.f32 1.0, %v1892_v57  ;;  %v2040_v47 = vpop.f32.mrf.mxu0  ;;  %v2042_v29 = vpop.f32.mrf.mxu1 }
 0x15f   :  { %v1259_v4 = vadd.f32 %v1258_v0, %v1257_v38  ;;  %v1394_v32 = vcombine.low %v1081_v26, %v1088_v63  ;;  %v1096_v43 = vadd.f32 %v936_v21, %v934_v11  ;;  %v1264_v45 = vadd.f32 %v984_v19, %v982_v60 }
 0x160   :  { %v1406_v3 = vcombine.low %v1249_v30, %v1256_v52  ;;  %v1425_v10 = vsel %vm1416_vm1, %v1423_v31, %v1424_v17  ;;  %v1449_v16 = vsel %vm1416_vm1, %v1447_v8, %v1448_v25  ;;  %v1092_v40 = vrot.slane %v1091_v37, 2  ;;  %v2062_v55 = vpop.f32.mrf.mxu1 }
 0x161   :  { %v1260_v9 = vrot.slane %v1259_v4, 2  ;;  %v1426_v36 = vrot.slane %v1394_v32, 6  ;;  %v1097_v51 = vrot.slane %v1096_v43, 4  ;;  %v1265_v56 = vrot.slane %v1264_v45, 4 }
 0x162   :  { %v1450_v48 = vrot.slane %v1406_v3, 6  ;;  %v937_v57 = vmul.f32 %v1980_v24, %v1836_v39  ;;  %v985_v62 = vmul.f32 %v1982_v35, %v1838_v1  ;;  %v939_v31 = vmul.f32 %v1994_v41, %v1846_v49  ;;  %v2060_v41 = vpop.f32.mrf.mxu0 }
 0x163   :  { %v987_v8 = vmul.f32 %v1996_v14, %v1848_v50  ;;  %v1427_v11 = vsel %vm1419_vm2, %v1426_v36, %v1425_v10  ;;  %v1098_v23 = vadd.f32 %v1097_v51, %v1096_v43  ;;  %v1266_v38 = vadd.f32 %v1265_v56, %v1264_v45  ;;  %v2088_v45 = vpop.f32.mrf.mxu1 }
 0x164   :  { %v1451_v60 = vsel %vm1419_vm2, %v1450_v48, %v1449_v16  ;;  %v1428_v26 = vsel %vm1421_vm3, %v1426_v36, %v1427_v11  ;;  %v938_v24 = vmul.f32 %v1986_v27, %v1840_v6  ;;  %v986_v35 = vmul.f32 %v1988_v20, %v1842_v42  ;;  %v2086_v43 = vpop.f32.mrf.mxu0 }
 0x165   :  { %v1452_v30 = vsel %vm1421_vm3, %v1450_v48, %v1451_v60  ;;  %1474 = vst [vmem:[%s2197_s3 + $0x8] sm:$0x77] %v1428_v26  ;;  %v2070_v14 = vadd.f32 %v1092_v40, %v1091_v37  ;;  %v2072_v54 = vadd.f32 %v1260_v9, %v1259_v4  ;;  %v1103_v27 = vadd.f32 %v939_v31, %v937_v57  ;;  %v2106_v60 = vpop.f32.mrf.mxu1 }
 0x166   :  { %1478 = vst [vmem:[%s2197_s3 + $0x28] sm:$0x77] %v1452_v30  ;;  %v1271_v17 = vadd.f32 %v987_v8, %v985_v62  ;;  %v1099_v25 = vrot.slane %v1098_v23, 2  ;;  %v1267_v20 = vrot.slane %v1266_v38, 2  ;;  %v940_v59 = vmul.f32 %v1998_v2, %v1850_v46  ;;  %v2104_v11 = vpop.f32.mrf.mxu0 }
 0x167   :  { %v988_v0 = vmul.f32 %v2000_v5, %v1864_v18  ;;  %v1104_v63 = vrot.slane %v1103_v27, 4  ;;  %v2206_v21 = vsub.f32 1.0, %v1860_v12  ;;  %v2207_v37 = vsub.f32 1.0, %v1870_v22 }
 0x168   :  { %v1272_v52 = vrot.slane %v1271_v17, 4  ;;  %v1110_v32 = vadd.f32 %v940_v59, %v938_v24  ;;  %v2090_v2 = vmax.f32 %v459_v13, 0.0  ;;  %v2092_v10 = vmax.f32 %v475_v34, 0.0 }
 0x169   :  { %v2080_v19 = vmax.f32 %v2206_v21, 0.0  ;;  %v2084_v4 = vmax.f32 %v2207_v37, 0.0  ;;  %v1278_v3 = vadd.f32 %v988_v0, %v986_v35  ;;  %v1094_v5 = vrot.slane %v2070_v14, 1 }
 0x16a   :  { %v1262_v12 = vrot.slane %v2072_v54, 1  ;;  %v1105_v16 = vadd.f32 %v1104_v63, %v1103_v27  ;;  %v1273_v40 = vadd.f32 %v1272_v52, %v1271_v17  ;;  %v1100_v9 = vadd.f32 %v1099_v25, %v1098_v23 }
 0x16b   :  { %v1268_v22 = vadd.f32 %v1267_v20, %v1266_v38  ;;  %v1111_v36 = vrot.slane %v1110_v32, 4  ;;  %v1279_v48 = vrot.slane %v1278_v3, 4  ;;  %v941_v57 = vmul.f32 %v2006_v15, %v1836_v39 }
 0x16c   :  { %v1106_v51 = vrot.slane %v1105_v16, 2  ;;  %v1274_v56 = vrot.slane %v1273_v40, 2  ;;  %v989_v13 = vmul.f32 %v2008_v44, %v1838_v1  ;;  %v943_v31 = vmul.f32 %v2022_v61, %v1846_v49 }
 0x16d   :  { %v1112_v34 = vadd.f32 %v1111_v36, %v1110_v32  ;;  %v1280_v62 = vadd.f32 %v1279_v48, %v1278_v3  ;;  %v991_v8 = vmul.f32 %v2024_v33, %v1848_v50  ;;  %v942_v39 = vmul.f32 %v2014_v58, %v1840_v6  ;;  %v2116_v6 = vpop.f32.mrf.mxu0  ;;  %v2118_v58 = vpop.f32.mrf.mxu1 }
 0x16e   :  { %v1107_v23 = vadd.f32 %v1106_v51, %v1105_v16  ;;  %v1275_v38 = vadd.f32 %v1274_v56, %v1273_v40  ;;  %v990_v1 = vmul.f32 %v2016_v28, %v1842_v42  ;;  %v1117_v26 = vadd.f32 %v943_v31, %v941_v57 }
 0x16f   :  { %v1113_v15 = vrot.slane %v1112_v34, 2  ;;  %v1281_v44 = vrot.slane %v1280_v62, 2  ;;  %v1285_v30 = vadd.f32 %v991_v8, %v989_v13  ;;  %v944_v50 = vmul.f32 %v2028_v7, %v1850_v46  ;;  %v2120_v16 = vpop.f32.mrf.mxu0  ;;  %v2122_v40 = vpop.f32.mrf.mxu1 }
 0x170   :  { %v1108_v49 = vrot.slane %v1107_v23, 1  ;;  %v1276_v61 = vrot.slane %v1275_v38, 1  ;;  %v992_v33 = vmul.f32 %v2030_v53, %v1864_v18  ;;  %v1118_v27 = vrot.slane %v1117_v26, 4 }
 0x171   :  { %v1114_v24 = vadd.f32 %v1113_v15, %v1112_v34  ;;  %v1282_v35 = vadd.f32 %v1281_v44, %v1280_v62  ;;  %v1286_v17 = vrot.slane %v1285_v30, 4  ;;  %v1101_v42 = vrot.slane %v1100_v9, 1  ;;  %v2209_v15 = vld [vmem:[#allocation10_spill] sm:$0xff] }
 0x172   :  { %v1269_v28 = vrot.slane %v1268_v22, 1  ;;  %v1124_v25 = vadd.f32 %v944_v50, %v942_v39  ;;  %v1292_v20 = vadd.f32 %v992_v33, %v990_v1  ;;  %v1119_v63 = vadd.f32 %v1118_v27, %v1117_v26  ;;  %v748_v26 = vpop.f32.mrf.mxu0 }
 0x173   :  { %v1115_v59 = vrot.slane %v1114_v24, 1  ;;  %v1283_v0 = vrot.slane %v1282_v35, 1  ;;  %v1287_v52 = vadd.f32 %v1286_v17, %v1285_v30  ;;  %v1109_v46 = vadd.f32 %v1108_v49, %v1107_v23  ;;  %v892_v30 = vpop.f32.mrf.mxu1  ;;  %v2211_v17 = vld [vmem:[#allocation12_spill] sm:$0xff] }
 0x174   :  { %v1277_v7 = vadd.f32 %v1276_v61, %v1275_v38  ;;  %v1125_v21 = vrot.slane %v1124_v25, 4  ;;  %v1293_v18 = vrot.slane %v1292_v20, 4  ;;  %v1120_v32 = vrot.slane %v1119_v63, 2 }
 0x175   :  { %v1116_v53 = vadd.f32 %v1115_v59, %v1114_v24  ;;  %v1284_v37 = vadd.f32 %v1283_v0, %v1282_v35  ;;  %v1288_v3 = vrot.slane %v1287_v52, 2  ;;  %v1102_v36 = vadd.f32 %v1101_v42, %v1100_v9 }
 0x176   :  { %v1270_v48 = vadd.f32 %v1269_v28, %v1268_v22  ;;  %v1126_v51 = vadd.f32 %v1125_v21, %v1124_v25  ;;  %v1294_v56 = vadd.f32 %v1293_v18, %v1292_v20  ;;  %v1121_v34 = vadd.f32 %v1120_v32, %v1119_v63  ;;  %v2208_v22 = vld [vmem:[#allocation9_spill] sm:$0xff]  ;;  %v750_v25 = vpop.f32.mrf.mxu0  ;;  %v894_v20 = vpop.f32.mrf.mxu1 }
 0x177   :  { %v1396_v57 = vcombine.low %v1109_v46, %v1116_v53  ;;  %v1408_v13 = vcombine.low %v1277_v7, %v1284_v37  ;;  %v1289_v62 = vadd.f32 %v1288_v3, %v1287_v52  ;;  %v947_v23 = vmul.f32 %v2086_v43, %v2080_v19 }
 0x178   :  { %v1127_v31 = vrot.slane %v1126_v51, 2  ;;  %v1295_v8 = vrot.slane %v1294_v56, 2  ;;  %v995_v38 = vmul.f32 %v2088_v45, %v2084_v4  ;;  %v1095_v39 = vadd.f32 %v1094_v5, %v2070_v14 }
 0x179   :  { %v1263_v9 = vadd.f32 %v1262_v12, %v2072_v54  ;;  %v945_v1 = vmul.f32 %v2040_v47, %v2208_v22  ;;  %v993_v44 = vmul.f32 %v2042_v29, %v2209_v15  ;;  %v1122_v43 = vrot.slane %v1121_v34, 1  ;;  %v2210_v12 = vld [vmem:[#allocation11_spill] sm:$0xff] }
 0x17a   :  { %v1290_v49 = vrot.slane %v1289_v62, 1  ;;  %v1128_v61 = vadd.f32 %v1127_v31, %v1126_v51  ;;  %v1296_v45 = vadd.f32 %v1295_v8, %v1294_v56  ;;  %v1395_v50 = vcombine.low %v1095_v39, %v1102_v36  ;;  %v754_v36 = vpop.f32.mrf.mxu0 }
 0x17b   :  { %v1407_v33 = vcombine.low %v1263_v9, %v1270_v48  ;;  %v1131_v24 = vadd.f32 %v947_v23, %v945_v1  ;;  %v1299_v14 = vadd.f32 %v995_v38, %v993_v44  ;;  %v1429_v5 = vrot.slane %v1396_v57, 7  ;;  %v898_v48 = vpop.f32.mrf.mxu1 }
 0x17c   :  { %v1453_v35 = vrot.slane %v1408_v13, 7  ;;  %v1129_v27 = vrot.slane %v1128_v61, 1  ;;  %v1297_v54 = vrot.slane %v1296_v45, 1  ;;  %v946_v47 = vmul.f32 %v2060_v41, %v2210_v12  ;;  %v756_v1 = vpop.f32.mrf.mxu0 }
 0x17d   :  { %v994_v29 = vmul.f32 %v2062_v55, %v2211_v17  ;;  %v948_v42 = vmul.f32 %v2104_v11, %v2090_v2  ;;  %v996_v28 = vmul.f32 %v2106_v60, %v2092_v10  ;;  %v1123_v59 = vadd.f32 %v1122_v43, %v1121_v34  ;;  %v900_v44 = vpop.f32.mrf.mxu1 }
 0x17e   :  { %v1291_v0 = vadd.f32 %v1290_v49, %v1289_v62  ;;  %v1130_v63 = vadd.f32 %v1129_v27, %v1128_v61  ;;  %v1298_v52 = vadd.f32 %v1297_v54, %v1296_v45  ;;  %v1132_v46 = vrot.slane %v1131_v24, 4 }
 0x17f   :  { %v1300_v7 = vrot.slane %v1299_v14, 4  ;;  %v1138_v21 = vadd.f32 %v948_v42, %v946_v47  ;;  %v1306_v18 = vadd.f32 %v996_v28, %v994_v29  ;;  %v1430_v41 = vsel %vm1414_vm0, %v1429_v5, %v1395_v50  ;;  %v760_v47 = vpop.f32.mrf.mxu0  ;;  %v904_v29 = vpop.f32.mrf.mxu1 }
 0x180   :  { %v1454_v55 = vsel %vm1414_vm0, %v1453_v35, %v1407_v33  ;;  %v1397_v53 = vcombine.low %v1123_v59, %v1130_v63  ;;  %v1409_v37 = vcombine.low %v1291_v0, %v1298_v52  ;;  %v949_v60 = vmul.f32 %v2116_v6, %v2208_v22 }
 0x181   :  { %v1139_v11 = vrot.slane %v1138_v21, 4  ;;  %v1307_v32 = vrot.slane %v1306_v18, 4  ;;  %v997_v3 = vmul.f32 %v2118_v58, %v2209_v15  ;;  %v951_v57 = vmul.f32 %v748_v26, %v2080_v19 }
 0x182   :  { %v1432_v51 = vrot.slane %v1397_v53, 6  ;;  %v1456_v56 = vrot.slane %v1409_v37, 6  ;;  %v999_v13 = vmul.f32 %v892_v30, %v2084_v4  ;;  %v1431_v34 = vsel %vm1416_vm1, %v1429_v5, %v1430_v41  ;;  %v762_v41 = vpop.f32.mrf.mxu0 }
 0x183   :  { %v1455_v62 = vsel %vm1416_vm1, %v1453_v35, %v1454_v55  ;;  %v1133_v31 = vadd.f32 %v1132_v46, %v1131_v24  ;;  %v1301_v8 = vadd.f32 %v1300_v7, %v1299_v14  ;;  %v1145_v38 = vadd.f32 %v951_v57, %v949_v60  ;;  %v906_v55 = vpop.f32.mrf.mxu1 }
 0x184   :  { %v1433_v23 = vsel %vm1419_vm2, %v1432_v51, %v1431_v34  ;;  %v1457_v6 = vsel %vm1419_vm2, %v1456_v56, %v1455_v62  ;;  %v1313_v58 = vadd.f32 %v999_v13, %v997_v3  ;;  %v1140_v26 = vadd.f32 %v1139_v11, %v1138_v21 }
 0x185   :  { %v1434_v39 = vsel %vm1421_vm3, %v1432_v51, %v1433_v23  ;;  %v1458_v9 = vsel %vm1421_vm3, %v1456_v56, %v1457_v6  ;;  %v1308_v30 = vadd.f32 %v1307_v32, %v1306_v18  ;;  %v1146_v43 = vrot.slane %v1145_v38, 4 }
 0x186   :  { %1475 = vst [vmem:[%s2197_s3 + $0x10] sm:$0x77] %v1434_v39  ;;  %1479 = vst [vmem:[%s2197_s3 + $0x30] sm:$0x77] %v1458_v9  ;;  %v1314_v49 = vrot.slane %v1313_v58, 4  ;;  %v950_v61 = vmul.f32 %v2120_v16, %v2210_v12  ;;  %v998_v45 = vmul.f32 %v2122_v40, %v2211_v17  ;;  %v952_v50 = vmul.f32 %v750_v25, %v2090_v2 }
 0x187   :  { %v1000_v33 = vmul.f32 %v894_v20, %v2092_v10  ;;  %v1134_v24 = vrot.slane %v1133_v31, 2  ;;  %v1302_v14 = vrot.slane %v1301_v8, 2  ;;  %v1147_v5 = vadd.f32 %v1146_v43, %v1145_v38 }
 0x188   :  { %v1315_v35 = vadd.f32 %v1314_v49, %v1313_v58  ;;  %v1152_v27 = vadd.f32 %v952_v50, %v950_v61  ;;  %v1141_v42 = vrot.slane %v1140_v26, 2  ;;  %v1309_v28 = vrot.slane %v1308_v30, 2 }
 0x189   :  { %v1320_v54 = vadd.f32 %v1000_v33, %v998_v45  ;;  %v1148_v59 = vrot.slane %v1147_v5, 2  ;;  %v1135_v52 = vadd.f32 %v1134_v24, %v1133_v31  ;;  %v1303_v40 = vadd.f32 %v1302_v14, %v1301_v8 }
 0x18a   :  { %v1316_v0 = vrot.slane %v1315_v35, 2  ;;  %v1153_v16 = vrot.slane %v1152_v27, 4  ;;  %v953_v25 = vmul.f32 %v754_v36, %v2208_v22  ;;  %v1001_v20 = vmul.f32 %v898_v48, %v2209_v15 }
 0x18b   :  { %v1321_v63 = vrot.slane %v1320_v54, 4  ;;  %v955_v21 = vmul.f32 %v760_v47, %v2080_v19  ;;  %v1003_v18 = vmul.f32 %v904_v29, %v2084_v4  ;;  %v1142_v53 = vadd.f32 %v1141_v42, %v1140_v26 }
 0x18c   :  { %v1154_v46 = vadd.f32 %v1153_v16, %v1152_v27  ;;  %v1310_v37 = vadd.f32 %v1309_v28, %v1308_v30  ;;  %v1149_v11 = vadd.f32 %v1148_v59, %v1147_v5  ;;  %v1317_v32 = vadd.f32 %v1316_v0, %v1315_v35 }
 0x18d   :  { %v1322_v7 = vadd.f32 %v1321_v63, %v1320_v54  ;;  %v1159_v51 = vadd.f32 %v955_v21, %v953_v25  ;;  %v1327_v56 = vadd.f32 %v1003_v18, %v1001_v20  ;;  %v954_v22 = vmul.f32 %v756_v1, %v2210_v12 }
 0x18e   :  { %v1155_v60 = vrot.slane %v1154_v46, 2  ;;  %v1002_v15 = vmul.f32 %v900_v44, %v2211_v17  ;;  %v956_v36 = vmul.f32 %v762_v41, %v2090_v2  ;;  %v1004_v19 = vmul.f32 %v906_v55, %v2092_v10 }
 0x18f   :  { %v1323_v3 = vrot.slane %v1322_v7, 2  ;;  %v1160_v57 = vrot.slane %v1159_v51, 4  ;;  %v1328_v13 = vrot.slane %v1327_v56, 4  ;;  %v1150_v34 = vrot.slane %v1149_v11, 1 }
 0x190   :  { %v1156_v48 = vadd.f32 %v1155_v60, %v1154_v46  ;;  %v1318_v62 = vrot.slane %v1317_v32, 1  ;;  %v1166_v31 = vadd.f32 %v956_v36, %v954_v22  ;;  %v1334_v8 = vadd.f32 %v1004_v19, %v1002_v15 }
 0x191   :  { %v1324_v4 = vadd.f32 %v1323_v3, %v1322_v7  ;;  %v1161_v38 = vadd.f32 %v1160_v57, %v1159_v51  ;;  %v1329_v58 = vadd.f32 %v1328_v13, %v1327_v56  ;;  %v1143_v39 = vrot.slane %v1142_v53, 1 }
 0x192   :  { %v1157_v23 = vrot.slane %v1156_v48, 1  ;;  %v1311_v12 = vrot.slane %v1310_v37, 1  ;;  %v1167_v9 = vrot.slane %v1166_v31, 4  ;;  %v1335_v17 = vrot.slane %v1334_v8, 4 }
 0x193   :  { %v1325_v6 = vrot.slane %v1324_v4, 1  ;;  %v1162_v44 = vrot.slane %v1161_v38, 2  ;;  %v1330_v10 = vrot.slane %v1329_v58, 2  ;;  %v1151_v26 = vadd.f32 %v1150_v34, %v1149_v11 }
 0x194   :  { %v1158_v1 = vadd.f32 %v1157_v23, %v1156_v48  ;;  %v1319_v30 = vadd.f32 %v1318_v62, %v1317_v32  ;;  %v1168_v43 = vadd.f32 %v1167_v9, %v1166_v31  ;;  %v1336_v49 = vadd.f32 %v1335_v17, %v1334_v8 }
 0x195   :  { %v1326_v2 = vadd.f32 %v1325_v6, %v1324_v4  ;;  %v1136_v61 = vrot.slane %v1135_v52, 1  ;;  %v1304_v45 = vrot.slane %v1303_v40, 1  ;;  %v1163_v50 = vadd.f32 %v1162_v44, %v1161_v38 }
 0x196   :  { %v1331_v33 = vadd.f32 %v1330_v10, %v1329_v58  ;;  %v1399_v24 = vcombine.low %v1151_v26, %v1158_v1  ;;  %v1169_v5 = vrot.slane %v1168_v43, 2  ;;  %v1337_v35 = vrot.slane %v1336_v49, 2 }
 0x197   :  { %v1411_v14 = vcombine.low %v1319_v30, %v1326_v2  ;;  %v1144_v27 = vadd.f32 %v1143_v39, %v1142_v53  ;;  %v1312_v54 = vadd.f32 %v1311_v12, %v1310_v37  ;;  %v1164_v47 = vrot.slane %v1163_v50, 1 }
 0x198   :  { %v1332_v29 = vrot.slane %v1331_v33, 1  ;;  %v1170_v42 = vadd.f32 %v1169_v5, %v1168_v43  ;;  %v1338_v28 = vadd.f32 %v1337_v35, %v1336_v49  ;;  %v1137_v59 = vadd.f32 %v1136_v61, %v1135_v52 }
 0x199   :  { %v1305_v0 = vadd.f32 %v1304_v45, %v1303_v40  ;;  %v1435_v16 = vrot.slane %v1399_v24, 7  ;;  %v1459_v63 = vrot.slane %v1411_v14, 7  ;;  %v1165_v21 = vadd.f32 %v1164_v47, %v1163_v50 }
 0x19a   :  { %v1171_v25 = vrot.slane %v1170_v42, 1  ;;  %v1339_v20 = vrot.slane %v1338_v28, 1  ;;  %v1398_v46 = vcombine.low %v1137_v59, %v1144_v27  ;;  %v1333_v18 = vadd.f32 %v1332_v29, %v1331_v33 }
 0x19b   :  { %v1410_v7 = vcombine.low %v1305_v0, %v1312_v54 }
 0x19c   :  { %v1172_v41 = vadd.f32 %v1171_v25, %v1170_v42  ;;  %v1340_v55 = vadd.f32 %v1339_v20, %v1338_v28  ;;  %v1436_v11 = vsel %vm1414_vm0, %v1435_v16, %v1398_v46 }
 0x19d   :  { %v1460_v53 = vsel %vm1414_vm0, %v1459_v63, %v1410_v7  ;;  %v1437_v52 = vsel %vm1416_vm1, %v1435_v16, %v1436_v11 }
 0x19e   :  { %v1400_v37 = vcombine.low %v1165_v21, %v1172_v41  ;;  %v1412_v32 = vcombine.low %v1333_v18, %v1340_v55  ;;  %v1461_v40 = vsel %vm1416_vm1, %v1459_v63, %v1460_v53 }
 0x1a0   :  { %v1438_v60 = vrot.slane %v1400_v37, 6  ;;  %v1462_v3 = vrot.slane %v1412_v32, 6 }
 0x1a2   :  { %v1439_v51 = vsel %vm1419_vm2, %v1438_v60, %v1437_v52  ;;  %v1463_v56 = vsel %vm1419_vm2, %v1462_v3, %v1461_v40 }
 0x1a3   :  { %v1440_v22 = vsel %vm1421_vm3, %v1438_v60, %v1439_v51  ;;  %v1464_v15 = vsel %vm1421_vm3, %v1462_v3, %v1463_v56 }
 0x1a4   :  { %1476 = vst [vmem:[%s2197_s3 + $0x18] sm:$0x77] %v1440_v22  ;;  %1480 = vst [vmem:[%s2197_s3 + $0x38] sm:$0x77] %v1464_v15 }
 0x1a5   :  { %1485 = vsyncpa [#allocation3], 1 }
 0x1a6   :  { %1486 = vsyncpa [#allocation5], 1 }

</bundles_post_ra>
